<compile_context>
chip_gen: v7x
topology: tpu7x:2x2x1
jax: 0.10.0
libtpu: 0.0.40
codegen_flags: <defaults>
</compile_context>

<pallas_src>
import numpy as np
import jax
import jax.numpy as jnp
from jax.experimental import pallas as pl
from jax.experimental.pallas import tpu as pltpu  # noqa: F401  (TPU backend)

# ---------------- small synthetic config ----------------
B = 2          # batch
S = 8          # sequence length
H = 32         # transformer_embedding_size (hidden)
NH = 2         # attention heads
HD = H // NH   # head dim
F = 64         # FFN intermediate size
L = 2          # encoder layers
VOCAB = 50
OUT_DIM = 16   # projection out_dim
NUM_TYPES = 4  # entity types
LN_EPS = 1e-12
VEC_PAD = 128  # lane-padded width of the packed per-layer bias/gain rows


def _layernorm(x, g, b):
    mu = jnp.mean(x, axis=-1, keepdims=True)
    var = jnp.mean((x - mu) ** 2, axis=-1, keepdims=True)
    return (x - mu) * jax.lax.rsqrt(var + LN_EPS) * g + b


# ============ Pallas kernel 1: fully fused BERT encoder (all layers, all batch)
def encoder_kernel(x_ref, bias_ref, wqkv_ref, wo_ref, wff1_ref, wff2_ref,
                   vecs_ref, o_ref):
    x = x_ref[...]                       # (B*S, H)
    bias = bias_ref[...]                 # (B*S, B*S) additive attention bias
    scale = 1.0 / float(HD) ** 0.5

    for l in range(L):                   # static unroll: layers fused, hidden stays on-chip
        wqkv = wqkv_ref[l]               # (H, 3H)
        wo = wo_ref[l]                   # (H, H)
        wff1 = wff1_ref[l]               # (H, F)
        wff2 = wff2_ref[l]               # (F, H)
        v = vecs_ref[l]                  # (8, VEC_PAD) packed bias/gain rows
        b_qkv = v[0:1, 0:3 * H]
        b_o = v[1:2, 0:H]
        b_ff1 = v[2:3, 0:F]
        b_ff2 = v[3:4, 0:H]
        g1 = v[4:5, 0:H]
        be1 = v[5:6, 0:H]
        g2 = v[6:7, 0:H]
        be2 = v[7:8, 0:H]

        qkv = jnp.dot(x, wqkv, preferred_element_type=jnp.float32) + b_qkv   # (B*S, 3H)

        ctxs = []
        for h in range(NH):              # static unroll over heads
            qh = qkv[:, h * HD:(h + 1) * HD]
            kh = qkv[:, H + h * HD:H + (h + 1) * HD]
            vh = qkv[:, 2 * H + h * HD:2 * H + (h + 1) * HD]
            s = jax.lax.dot_general(qh, kh, (((1,), (1,)), ((), ())),
                                    preferred_element_type=jnp.float32)
            s = s * scale + bias                                   # masks cross-batch + pads
            s = s - jnp.max(s, axis=-1, keepdims=True)
            e = jnp.exp(s)
            p = e * pl.reciprocal(jnp.sum(e, axis=-1, keepdims=True), approx=True)
            ctxs.append(jnp.dot(p, vh, preferred_element_type=jnp.float32))  # (B*S, HD)
        ctx_all = jnp.concatenate(ctxs, axis=1)                     # (B*S, H)
        attn = jnp.dot(ctx_all, wo, preferred_element_type=jnp.float32) + b_o

        h1 = _layernorm(x + attn, g1, be1)
        ff = jnp.dot(
            jax.nn.gelu(jnp.dot(h1, wff1, preferred_element_type=jnp.float32) + b_ff1,
                        approximate=True),
            wff2, preferred_element_type=jnp.float32) + b_ff2
        x = _layernorm(h1 + ff, g2, be2)

    o_ref[...] = x


def encoder_forward(x0, attn_bias, params):
    # Single invocation, no grid: every operand is a whole-array VMEM block.
    return pl.pallas_call(
        encoder_kernel,
        out_shape=jax.ShapeDtypeStruct((B * S, H), jnp.float32),
    )(x0, attn_bias, params["w_qkv"], params["w_o"], params["w_ff1"],
      params["w_ff2"], params["vecs"])


# ============ Pallas kernel 2: span means + projection + entity typer (fused)
def head_kernel(emb_ref, fs_ref, fe_ref, pw_ref, pb_ref, tw_ref, tb_ref,
                proj_ref, types_ref):
    emb = emb_ref[...]                   # (B*S, H)
    fs = fs_ref[...]                     # (M, 1) int32 flat start row (inclusive)
    fe = fe_ref[...]                     # (M, 1) int32 flat end row (inclusive)
    M = fs.shape[0]

    # all M span means as one masked matmul: weights[m, r] = 1/count_m on the span
    col = jax.lax.broadcasted_iota(jnp.int32, (M, B * S), 1)
    sel = jnp.logical_and(col >= fs, col <= fe).astype(jnp.float32)          # (M, B*S)
    inv_cnt = pl.reciprocal((fe - fs + 1).astype(jnp.float32), approx=True)  # (M, 1)
    mention = jnp.dot(sel * inv_cnt, emb, preferred_element_type=jnp.float32)  # (M, H)

    # CLS rows (token 0 of each batch element) + mentions -> one projection matmul
    cls_rows = jnp.concatenate([emb[b * S:b * S + 1, :] for b in range(B)], axis=0)
    combined = jnp.concatenate([cls_rows, mention], axis=0)                  # (B+M, H)
    proj = jnp.dot(combined, pw_ref[...],
                   preferred_element_type=jnp.float32) + pb_ref[...]         # (B+M, OUT)
    proj_ref[...] = proj
    # TODO(synk): EntityTyper class definition not provided; assumed Linear(out_dim, num_types).
    types_ref[...] = jnp.dot(proj[B:, :], tw_ref[...],
                             preferred_element_type=jnp.float32) + tb_ref[...]


def head_forward(emb, flat_start, flat_end, params):
    M = flat_start.shape[0]
    return pl.pallas_call(
        head_kernel,
        out_shape=(jax.ShapeDtypeStruct((B + M, OUT_DIM), jnp.float32),
                   jax.ShapeDtypeStruct((M, NUM_TYPES), jnp.float32)),
    )(emb, flat_start, flat_end, params["proj_w"], params["proj_b"],
      params["typer_w"], params["typer_b"])


# ================= BertDocumentEmbedder forward ==============================
def bert_document_embedder(params, input_ids, attention_masks,
                           mention_batch, mention_start, mention_end):
    # synthetic BertModel embedding lookup (plain JAX glue), flattened to (B*S, H)
    x0 = (params["word_emb"][input_ids] + params["pos_emb"][None, :, :]).reshape(B * S, H)

    # additive attention bias over flattened rows:
    #   0 for same-batch & valid keys, -1e9 for cross-batch or padded keys.
    r = jnp.arange(B * S)
    same_batch = (r[:, None] // S) == (r[None, :] // S)
    key_valid = attention_masks.reshape(1, B * S) > 0
    attn_bias = jnp.where(same_batch & key_valid, 0.0, -1e9).astype(jnp.float32)

    embedded = encoder_forward(x0, attn_bias, params)          # last_hidden_state, (B*S, H)

    # precondition: mention lists are host-filtered (no -1 entries, valid spans)
    flat_start = (mention_batch * S + mention_start).astype(jnp.int32).reshape(-1, 1)
    flat_end = (mention_batch * S + mention_end).astype(jnp.int32).reshape(-1, 1)
    proj, entity_type_predictions = head_forward(embedded, flat_start, flat_end, params)

    cls_embeddings = proj[:B]                                   # [B, out_dim]
    entity_mention_embeddings = proj[B:]                        # [M, out_dim]
    return cls_embeddings, entity_mention_embeddings, entity_type_predictions


# ================= pure-JAX reference (for verification) =====================
def ref_forward(params, input_ids, attention_masks, starts, ends):
    x = params["word_emb"][input_ids] + params["pos_emb"][None, :, :]
    bias = (1.0 - attention_masks.astype(jnp.float32))[:, None, :] * (-1e9)   # (B,1,S)
    for lp in params["raw_layers"]:
        qkv = jnp.einsum("bsh,hk->bsk", x, lp["wqkv"]) + lp["bqkv"]
        scale = 1.0 / float(HD) ** 0.5
        attn = jnp.zeros((B, S, H), jnp.float32)
        for h in range(NH):
            qh = qkv[:, :, h * HD:(h + 1) * HD]
            kh = qkv[:, :, H + h * HD:H + (h + 1) * HD]
            vh = qkv[:, :, 2 * H + h * HD:2 * H + (h + 1) * HD]
            sc = jnp.einsum("bqd,bkd->bqk", qh, kh) * scale + bias
            p = jax.nn.softmax(sc, axis=-1)
            ctx = jnp.einsum("bqk,bkd->bqd", p, vh)
            attn = attn + jnp.einsum("bqd,dh->bqh", ctx, lp["wo"][h * HD:(h + 1) * HD, :])
        attn = attn + lp["bo"]
        h1 = _layernorm(x + attn, lp["g1"], lp["be1"])
        ff = jnp.einsum("bsf,fh->bsh",
                        jax.nn.gelu(jnp.einsum("bsh,hf->bsf", h1, lp["wff1"]) + lp["bff1"],
                                    approximate=True), lp["wff2"]) + lp["bff2"]
        x = _layernorm(h1 + ff, lp["g2"], lp["be2"])
    embedded = np.asarray(x)
    mentions = []
    for idx in range(B):
        for s_, e_ in zip(starts[idx], ends[idx]):
            if s_ != -1:
                mentions.append(embedded[idx, s_:e_ + 1, :].mean(axis=0))
    ment = np.stack(mentions)
    proj_w, proj_b = np.asarray(params["proj_w"]), np.asarray(params["proj_b"])
    cls = embedded[:, 0, :] @ proj_w + proj_b
    ment_p = ment @ proj_w + proj_b
    types = ment_p @ np.asarray(params["typer_w"]) + np.asarray(params["typer_b"])
    return cls, ment_p, types


# ================= main =======================================================
if __name__ == "__main__":
    keys = iter(jax.random.split(jax.random.PRNGKey(0), 64))

    def rnd(shape, scale=0.02):
        return (scale * jax.random.normal(next(keys), shape)).astype(jnp.float32)

    raw_layers = []
    for _ in range(L):
        raw_layers.append(dict(
            wqkv=rnd((H, 3 * H)), bqkv=rnd((1, 3 * H)),
            wo=rnd((H, H)), bo=rnd((1, H)),
            g1=jnp.ones((1, H), jnp.float32), be1=jnp.zeros((1, H), jnp.float32),
            wff1=rnd((H, F)), bff1=rnd((1, F)),
            wff2=rnd((F, H)), bff2=rnd((1, H)),
            g2=jnp.ones((1, H), jnp.float32), be2=jnp.zeros((1, H), jnp.float32),
        ))

    # stack per-layer weights as [L, ...] and pack the 8 bias/gain vectors per
    # layer into one lane-padded [L, 8, 128] tensor (single DMA instead of 12).
    def pad_row(v):
        return jnp.pad(v, ((0, 0), (0, VEC_PAD - v.shape[-1])))

    vecs = jnp.stack([
        jnp.concatenate([pad_row(lp["bqkv"]), pad_row(lp["bo"]), pad_row(lp["bff1"]),
                         pad_row(lp["bff2"]), pad_row(lp["g1"]), pad_row(lp["be1"]),
                         pad_row(lp["g2"]), pad_row(lp["be2"])], axis=0)
        for lp in raw_layers])                                   # (L, 8, VEC_PAD)

    params = dict(
        word_emb=rnd((VOCAB, H), 0.1),
        pos_emb=rnd((S, H), 0.1),
        w_qkv=jnp.stack([lp["wqkv"] for lp in raw_layers]),      # (L, H, 3H)
        w_o=jnp.stack([lp["wo"] for lp in raw_layers]),          # (L, H, H)
        w_ff1=jnp.stack([lp["wff1"] for lp in raw_layers]),      # (L, H, F)
        w_ff2=jnp.stack([lp["wff2"] for lp in raw_layers]),      # (L, F, H)
        vecs=vecs,
        proj_w=rnd((H, OUT_DIM), 0.05), proj_b=rnd((1, OUT_DIM), 0.05),
        typer_w=rnd((OUT_DIM, NUM_TYPES), 0.05), typer_b=rnd((1, NUM_TYPES), 0.05),
        raw_layers=raw_layers,                                   # reference only
    )

    input_ids = jax.random.randint(next(keys), (B, S), 0, VOCAB, dtype=jnp.int32)
    attention_masks = jnp.array([[1] * S, [1] * (S - 2) + [0] * 2], dtype=jnp.int32)

    # padded per-example mention positions (-1 = no mention), as in the torch API
    start_positions = np.array([[1, 4, -1], [0, -1, -1]], dtype=np.int32)
    end_positions = np.array([[2, 6, -1], [3, -1, -1]], dtype=np.int32)

    # host-side filtering of valid mentions (output count must be static in JAX)
    mb, ms, me = [], [], []
    for idx in range(B):
        for s_, e_ in zip(start_positions[idx], end_positions[idx]):
            if s_ != -1:
                mb.append(idx)
                ms.append(int(s_))
                me.append(int(e_))
    mention_batch = jnp.array(mb, dtype=jnp.int32)
    mention_start = jnp.array(ms, dtype=jnp.int32)
    mention_end = jnp.array(me, dtype=jnp.int32)

    fwd = jax.jit(bert_document_embedder)
    cls_emb, mention_emb, type_pred = fwd(
        params, input_ids, attention_masks, mention_batch, mention_start, mention_end)
    jax.block_until_ready((cls_emb, mention_emb, type_pred))

    r_cls, r_ment, r_types = ref_forward(params, input_ids, attention_masks,
                                         start_positions, end_positions)
    np.testing.assert_allclose(np.asarray(cls_emb), r_cls, rtol=5e-2, atol=5e-2)
    np.testing.assert_allclose(np.asarray(mention_emb), r_ment, rtol=5e-2, atol=5e-2)
    np.testing.assert_allclose(np.asarray(type_pred), r_types, rtol=5e-2, atol=5e-2)

    assert cls_emb.shape == (B, OUT_DIM)
    assert mention_emb.shape == (len(mb), OUT_DIM)
    assert type_pred.shape == (len(mb), NUM_TYPES)
    print("KERNEL_OK")
</pallas_src>

<mosaic_0001>
module attributes {stable_mosaic.version = 11 : i64} {
  func.func @head_kernel(%arg0: memref<16x32xf32, #tpu.memory_space<vmem>>, %arg1: memref<3x1xi32, #tpu.memory_space<vmem>>, %arg2: memref<3x1xi32, #tpu.memory_space<vmem>>, %arg3: memref<32x16xf32, #tpu.memory_space<vmem>>, %arg4: memref<1x16xf32, #tpu.memory_space<vmem>>, %arg5: memref<16x4xf32, #tpu.memory_space<vmem>>, %arg6: memref<1x4xf32, #tpu.memory_space<vmem>>, %arg7: memref<5x16xf32, #tpu.memory_space<vmem>>, %arg8: memref<3x4xf32, #tpu.memory_space<vmem>>) attributes {dimension_semantics = [], scalar_prefetch = 0 : i64, scratch_operands = 0 : i64, tpu.core_type = #tpu.core_type<tc>} {
    %c0 = arith.constant 0 : index
    %c0_0 = arith.constant 0 : index
    %0 = vector.load %arg0[%c0, %c0_0] : memref<16x32xf32, #tpu.memory_space<vmem>>, vector<16x32xf32>
    %c0_1 = arith.constant 0 : index
    %c0_2 = arith.constant 0 : index
    %1 = vector.load %arg1[%c0_1, %c0_2] : memref<3x1xi32, #tpu.memory_space<vmem>>, vector<3x1xi32>
    %c0_3 = arith.constant 0 : index
    %c0_4 = arith.constant 0 : index
    %2 = vector.load %arg2[%c0_3, %c0_4] : memref<3x1xi32, #tpu.memory_space<vmem>>, vector<3x1xi32>
    %3 = tpu.iota {dimensions = array<i32: 1>} : vector<3x16xi32>
    %4 = vector.broadcast %1 : vector<3x1xi32> to vector<3x16xi32>
    %5 = arith.cmpi sge, %3, %4 : vector<3x16xi32>
    %6 = vector.broadcast %2 : vector<3x1xi32> to vector<3x16xi32>
    %7 = arith.cmpi sle, %3, %6 : vector<3x16xi32>
    %8 = arith.andi %5, %7 : vector<3x16xi1>
    %9 = arith.extui %8 : vector<3x16xi1> to vector<3x16xi32>
    %10 = arith.sitofp %9 : vector<3x16xi32> to vector<3x16xf32>
    %11 = arith.subi %2, %1 : vector<3x1xi32>
    %c1_i32 = arith.constant 1 : i32
    %12 = vector.broadcast %c1_i32 : i32 to vector<3x1xi32>
    %13 = arith.addi %11, %12 : vector<3x1xi32>
    %14 = arith.sitofp %13 : vector<3x1xi32> to vector<3x1xf32>
    %15 = tpu.reciprocal %14 {approx = true} : vector<3x1xf32> -> vector<3x1xf32>
    %16 = vector.broadcast %15 : vector<3x1xf32> to vector<3x16xf32>
    %17 = arith.mulf %10, %16 : vector<3x16xf32>
    %cst = arith.constant dense<0.000000e+00> : vector<3x32xf32>
    %18 = tpu.matmul %17, %0, %cst {dimension_numbers = #tpu.dot_dimension_numbers<[1], [0], [0], [1], [0, 0, 1, 1], [], []>} : vector<3x16xf32>, vector<16x32xf32>, vector<3x32xf32> -> vector<3x32xf32>
    %19 = vector.extract_strided_slice %0 {offsets = [0, 0], sizes = [1, 32], strides = [1, 1]} : vector<16x32xf32> to vector<1x32xf32>
    %20 = vector.extract_strided_slice %0 {offsets = [8, 0], sizes = [1, 32], strides = [1, 1]} : vector<16x32xf32> to vector<1x32xf32>
    %21 = tpu.concatenate %19, %20 in 0 : vector<1x32xf32>, vector<1x32xf32> -> vector<2x32xf32>
    %22 = tpu.concatenate %21, %18 in 0 : vector<2x32xf32>, vector<3x32xf32> -> vector<5x32xf32>
    %c0_5 = arith.constant 0 : index
    %c0_6 = arith.constant 0 : index
    %23 = vector.load %arg3[%c0_5, %c0_6] : memref<32x16xf32, #tpu.memory_space<vmem>>, vector<32x16xf32>
    %cst_7 = arith.constant dense<0.000000e+00> : vector<5x16xf32>
    %24 = tpu.matmul %22, %23, %cst_7 {dimension_numbers = #tpu.dot_dimension_numbers<[1], [0], [0], [1], [0, 0, 1, 1], [], []>} : vector<5x32xf32>, vector<32x16xf32>, vector<5x16xf32> -> vector<5x16xf32>
    %c0_8 = arith.constant 0 : index
    %c0_9 = arith.constant 0 : index
    %25 = vector.load %arg4[%c0_8, %c0_9] : memref<1x16xf32, #tpu.memory_space<vmem>>, vector<1x16xf32>
    %26 = vector.broadcast %25 : vector<1x16xf32> to vector<5x16xf32>
    %27 = arith.addf %24, %26 : vector<5x16xf32>
    %c0_10 = arith.constant 0 : index
    %c0_11 = arith.constant 0 : index
    %28 = vector.load %arg7[%c0_10, %c0_11] : memref<5x16xf32, #tpu.memory_space<vmem>>, vector<5x16xf32>
    tpu.vector_store %arg7[%c0_10, %c0_11], %27 {strides = array<i32>} : memref<5x16xf32, #tpu.memory_space<vmem>>, vector<5x16xf32>,
    %29 = vector.extract_strided_slice %27 {offsets = [2, 0], sizes = [3, 16], strides = [1, 1]} : vector<5x16xf32> to vector<3x16xf32>
    %c0_12 = arith.constant 0 : index
    %c0_13 = arith.constant 0 : index
    %30 = vector.load %arg5[%c0_12, %c0_13] : memref<16x4xf32, #tpu.memory_space<vmem>>, vector<16x4xf32>
    %cst_14 = arith.constant dense<0.000000e+00> : vector<3x4xf32>
    %31 = tpu.matmul %29, %30, %cst_14 {dimension_numbers = #tpu.dot_dimension_numbers<[1], [0], [0], [1], [0, 0, 1, 1], [], []>} : vector<3x16xf32>, vector<16x4xf32>, vector<3x4xf32> -> vector<3x4xf32>
    %c0_15 = arith.constant 0 : index
    %c0_16 = arith.constant 0 : index
    %32 = vector.load %arg6[%c0_15, %c0_16] : memref<1x4xf32, #tpu.memory_space<vmem>>, vector<1x4xf32>
    %33 = vector.broadcast %32 : vector<1x4xf32> to vector<3x4xf32>
    %34 = arith.addf %31, %33 : vector<3x4xf32>
    %c0_17 = arith.constant 0 : index
    %c0_18 = arith.constant 0 : index
    %35 = vector.load %arg8[%c0_17, %c0_18] : memref<3x4xf32, #tpu.memory_space<vmem>>, vector<3x4xf32>
    tpu.vector_store %arg8[%c0_17, %c0_18], %34 {strides = array<i32>} : memref<3x4xf32, #tpu.memory_space<vmem>>, vector<3x4xf32>,
    return
  }
}

module attributes {stable_mosaic.version = 11 : i64} {
  func.func @encoder_kernel(%arg0: memref<16x32xf32, #tpu.memory_space<vmem>>, %arg1: memref<16x16xf32, #tpu.memory_space<vmem>>, %arg2: memref<2x32x96xf32, #tpu.memory_space<vmem>>, %arg3: memref<2x32x32xf32, #tpu.memory_space<vmem>>, %arg4: memref<2x32x64xf32, #tpu.memory_space<vmem>>, %arg5: memref<2x64x32xf32, #tpu.memory_space<vmem>>, %arg6: memref<2x8x128xf32, #tpu.memory_space<vmem>>, %arg7: memref<16x32xf32, #tpu.memory_space<vmem>>) attributes {dimension_semantics = [], scalar_prefetch = 0 : i64, scratch_operands = 0 : i64, tpu.core_type = #tpu.core_type<tc>} {
    %c0 = arith.constant 0 : index
    %c0_0 = arith.constant 0 : index
    %0 = vector.load %arg0[%c0, %c0_0] : memref<16x32xf32, #tpu.memory_space<vmem>>, vector<16x32xf32>
    %c0_1 = arith.constant 0 : index
    %c0_2 = arith.constant 0 : index
    %1 = vector.load %arg1[%c0_1, %c0_2] : memref<16x16xf32, #tpu.memory_space<vmem>>, vector<16x16xf32>
    %c0_3 = arith.constant 0 : index
    %c0_4 = arith.constant 0 : index
    %c0_5 = arith.constant 0 : index
    %2 = vector.load %arg2[%c0_3, %c0_4, %c0_5] : memref<2x32x96xf32, #tpu.memory_space<vmem>>, vector<1x32x96xf32>
    %3 = vector.shape_cast %2 : vector<1x32x96xf32> to vector<32x96xf32>
    %c0_6 = arith.constant 0 : index
    %c0_7 = arith.constant 0 : index
    %c0_8 = arith.constant 0 : index
    %4 = vector.load %arg3[%c0_6, %c0_7, %c0_8] : memref<2x32x32xf32, #tpu.memory_space<vmem>>, vector<1x32x32xf32>
    %5 = vector.shape_cast %4 : vector<1x32x32xf32> to vector<32x32xf32>
    %c0_9 = arith.constant 0 : index
    %c0_10 = arith.constant 0 : index
    %c0_11 = arith.constant 0 : index
    %6 = vector.load %arg4[%c0_9, %c0_10, %c0_11] : memref<2x32x64xf32, #tpu.memory_space<vmem>>, vector<1x32x64xf32>
    %7 = vector.shape_cast %6 : vector<1x32x64xf32> to vector<32x64xf32>
    %c0_12 = arith.constant 0 : index
    %c0_13 = arith.constant 0 : index
    %c0_14 = arith.constant 0 : index
    %8 = vector.load %arg5[%c0_12, %c0_13, %c0_14] : memref<2x64x32xf32, #tpu.memory_space<vmem>>, vector<1x64x32xf32>
    %9 = vector.shape_cast %8 : vector<1x64x32xf32> to vector<64x32xf32>
    %c0_15 = arith.constant 0 : index
    %c0_16 = arith.constant 0 : index
    %c0_17 = arith.constant 0 : index
    %10 = vector.load %arg6[%c0_15, %c0_16, %c0_17] : memref<2x8x128xf32, #tpu.memory_space<vmem>>, vector<1x8x128xf32>
    %11 = vector.shape_cast %10 : vector<1x8x128xf32> to vector<8x128xf32>
    %12 = vector.extract_strided_slice %11 {offsets = [0, 0], sizes = [1, 96], strides = [1, 1]} : vector<8x128xf32> to vector<1x96xf32>
    %13 = vector.extract_strided_slice %11 {offsets = [1, 0], sizes = [1, 32], strides = [1, 1]} : vector<8x128xf32> to vector<1x32xf32>
    %14 = vector.extract_strided_slice %11 {offsets = [2, 0], sizes = [1, 64], strides = [1, 1]} : vector<8x128xf32> to vector<1x64xf32>
    %15 = vector.extract_strided_slice %11 {offsets = [3, 0], sizes = [1, 32], strides = [1, 1]} : vector<8x128xf32> to vector<1x32xf32>
    %16 = vector.extract_strided_slice %11 {offsets = [4, 0], sizes = [1, 32], strides = [1, 1]} : vector<8x128xf32> to vector<1x32xf32>
    %17 = vector.extract_strided_slice %11 {offsets = [5, 0], sizes = [1, 32], strides = [1, 1]} : vector<8x128xf32> to vector<1x32xf32>
    %18 = vector.extract_strided_slice %11 {offsets = [6, 0], sizes = [1, 32], strides = [1, 1]} : vector<8x128xf32> to vector<1x32xf32>
    %19 = vector.extract_strided_slice %11 {offsets = [7, 0], sizes = [1, 32], strides = [1, 1]} : vector<8x128xf32> to vector<1x32xf32>
    %cst = arith.constant dense<0.000000e+00> : vector<16x96xf32>
    %20 = tpu.matmul %0, %3, %cst {dimension_numbers = #tpu.dot_dimension_numbers<[1], [0], [0], [1], [0, 0, 1, 1], [], []>} : vector<16x32xf32>, vector<32x96xf32>, vector<16x96xf32> -> vector<16x96xf32>
    %21 = vector.broadcast %12 : vector<1x96xf32> to vector<16x96xf32>
    %22 = arith.addf %20, %21 : vector<16x96xf32>
    %23 = vector.extract_strided_slice %22 {offsets = [0, 0], sizes = [16, 16], strides = [1, 1]} : vector<16x96xf32> to vector<16x16xf32>
    %24 = vector.extract_strided_slice %22 {offsets = [0, 32], sizes = [16, 16], strides = [1, 1]} : vector<16x96xf32> to vector<16x16xf32>
    %25 = vector.extract_strided_slice %22 {offsets = [0, 64], sizes = [16, 16], strides = [1, 1]} : vector<16x96xf32> to vector<16x16xf32>
    %cst_18 = arith.constant dense<0.000000e+00> : vector<16x16xf32>
    %26 = tpu.matmul %23, %24, %cst_18 {dimension_numbers = #tpu.dot_dimension_numbers<[1], [1], [0], [0], [0, 0, 1, 0], [], []>} : vector<16x16xf32>, vector<16x16xf32>, vector<16x16xf32> -> vector<16x16xf32>
    %cst_19 = arith.constant 2.500000e-01 : f32
    %27 = vector.broadcast %cst_19 : f32 to vector<16x16xf32>
    %28 = arith.mulf %26, %27 : vector<16x16xf32>
    %29 = arith.addf %28, %1 : vector<16x16xf32>
    %cst_20 = arith.constant dense<0xFF800000> : vector<16xf32>
    %30 = vector.multi_reduction <maximumf>, %29, %cst_20 [1] : vector<16x16xf32> to vector<16xf32>
    %31 = vector.shape_cast %30 : vector<16xf32> to vector<16x1xf32>
    %32 = vector.broadcast %31 : vector<16x1xf32> to vector<16x16xf32>
    %33 = arith.subf %29, %32 : vector<16x16xf32>
    %34 = math.exp %33 : vector<16x16xf32>
    %cst_21 = arith.constant dense<0.000000e+00> : vector<16xf32>
    %35 = vector.multi_reduction <add>, %34, %cst_21 [1] : vector<16x16xf32> to vector<16xf32>
    %36 = vector.shape_cast %35 : vector<16xf32> to vector<16x1xf32>
    %37 = tpu.reciprocal %36 {approx = true} : vector<16x1xf32> -> vector<16x1xf32>
    %38 = vector.broadcast %37 : vector<16x1xf32> to vector<16x16xf32>
    %39 = arith.mulf %34, %38 : vector<16x16xf32>
    %cst_22 = arith.constant dense<0.000000e+00> : vector<16x16xf32>
    %40 = tpu.matmul %39, %25, %cst_22 {dimension_numbers = #tpu.dot_dimension_numbers<[1], [0], [0], [1], [0, 0, 1, 1], [], []>} : vector<16x16xf32>, vector<16x16xf32>, vector<16x16xf32> -> vector<16x16xf32>
    %41 = vector.extract_strided_slice %22 {offsets = [0, 16], sizes = [16, 16], strides = [1, 1]} : vector<16x96xf32> to vector<16x16xf32>
    %42 = vector.extract_strided_slice %22 {offsets = [0, 48], sizes = [16, 16], strides = [1, 1]} : vector<16x96xf32> to vector<16x16xf32>
    %43 = vector.extract_strided_slice %22 {offsets = [0, 80], sizes = [16, 16], strides = [1, 1]} : vector<16x96xf32> to vector<16x16xf32>
    %cst_23 = arith.constant dense<0.000000e+00> : vector<16x16xf32>
    %44 = tpu.matmul %41, %42, %cst_23 {dimension_numbers = #tpu.dot_dimension_numbers<[1], [1], [0], [0], [0, 0, 1, 0], [], []>} : vector<16x16xf32>, vector<16x16xf32>, vector<16x16xf32> -> vector<16x16xf32>
    %cst_24 = arith.constant 2.500000e-01 : f32
    %45 = vector.broadcast %cst_24 : f32 to vector<16x16xf32>
    %46 = arith.mulf %44, %45 : vector<16x16xf32>
    %47 = arith.addf %46, %1 : vector<16x16xf32>
    %cst_25 = arith.constant dense<0xFF800000> : vector<16xf32>
    %48 = vector.multi_reduction <maximumf>, %47, %cst_25 [1] : vector<16x16xf32> to vector<16xf32>
    %49 = vector.shape_cast %48 : vector<16xf32> to vector<16x1xf32>
    %50 = vector.broadcast %49 : vector<16x1xf32> to vector<16x16xf32>
    %51 = arith.subf %47, %50 : vector<16x16xf32>
    %52 = math.exp %51 : vector<16x16xf32>
    %cst_26 = arith.constant dense<0.000000e+00> : vector<16xf32>
    %53 = vector.multi_reduction <add>, %52, %cst_26 [1] : vector<16x16xf32> to vector<16xf32>
    %54 = vector.shape_cast %53 : vector<16xf32> to vector<16x1xf32>
    %55 = tpu.reciprocal %54 {approx = true} : vector<16x1xf32> -> vector<16x1xf32>
    %56 = vector.broadcast %55 : vector<16x1xf32> to vector<16x16xf32>
    %57 = arith.mulf %52, %56 : vector<16x16xf32>
    %cst_27 = arith.constant dense<0.000000e+00> : vector<16x16xf32>
    %58 = tpu.matmul %57, %43, %cst_27 {dimension_numbers = #tpu.dot_dimension_numbers<[1], [0], [0], [1], [0, 0, 1, 1], [], []>} : vector<16x16xf32>, vector<16x16xf32>, vector<16x16xf32> -> vector<16x16xf32>
    %59 = tpu.concatenate %40, %58 in 1 : vector<16x16xf32>, vector<16x16xf32> -> vector<16x32xf32>
    %cst_28 = arith.constant dense<0.000000e+00> : vector<16x32xf32>
    %60 = tpu.matmul %59, %5, %cst_28 {dimension_numbers = #tpu.dot_dimension_numbers<[1], [0], [0], [1], [0, 0, 1, 1], [], []>} : vector<16x32xf32>, vector<32x32xf32>, vector<16x32xf32> -> vector<16x32xf32>
    %61 = vector.broadcast %13 : vector<1x32xf32> to vector<16x32xf32>
    %62 = arith.addf %60, %61 : vector<16x32xf32>
    %63 = arith.addf %0, %62 : vector<16x32xf32>
    %cst_29 = arith.constant dense<0.000000e+00> : vector<16xf32>
    %64 = vector.multi_reduction <add>, %63, %cst_29 [1] : vector<16x32xf32> to vector<16xf32>
    %65 = vector.shape_cast %64 : vector<16xf32> to vector<16x1xf32>
    %cst_30 = arith.constant 3.200000e+01 : f32
    %66 = vector.broadcast %cst_30 : f32 to vector<16x1xf32>
    %67 = arith.divf %65, %66 : vector<16x1xf32>
    %68 = vector.broadcast %67 : vector<16x1xf32> to vector<16x32xf32>
    %69 = arith.subf %63, %68 : vector<16x32xf32>
    %70 = arith.mulf %69, %69 : vector<16x32xf32>
    %cst_31 = arith.constant dense<0.000000e+00> : vector<16xf32>
    %71 = vector.multi_reduction <add>, %70, %cst_31 [1] : vector<16x32xf32> to vector<16xf32>
    %72 = vector.shape_cast %71 : vector<16xf32> to vector<16x1xf32>
    %cst_32 = arith.constant 3.200000e+01 : f32
    %73 = vector.broadcast %cst_32 : f32 to vector<16x1xf32>
    %74 = arith.divf %72, %73 : vector<16x1xf32>
    %75 = vector.broadcast %67 : vector<16x1xf32> to vector<16x32xf32>
    %76 = arith.subf %63, %75 : vector<16x32xf32>
    %cst_33 = arith.constant 9.99999996E-13 : f32
    %77 = vector.broadcast %cst_33 : f32 to vector<16x1xf32>
    %78 = arith.addf %74, %77 : vector<16x1xf32>
    %79 = math.rsqrt %78 : vector<16x1xf32>
    %80 = vector.broadcast %79 : vector<16x1xf32> to vector<16x32xf32>
    %81 = arith.mulf %76, %80 : vector<16x32xf32>
    %82 = vector.broadcast %16 : vector<1x32xf32> to vector<16x32xf32>
    %83 = arith.mulf %81, %82 : vector<16x32xf32>
    %84 = vector.broadcast %17 : vector<1x32xf32> to vector<16x32xf32>
    %85 = arith.addf %83, %84 : vector<16x32xf32>
    %cst_34 = arith.constant dense<0.000000e+00> : vector<16x64xf32>
    %86 = tpu.matmul %85, %7, %cst_34 {dimension_numbers = #tpu.dot_dimension_numbers<[1], [0], [0], [1], [0, 0, 1, 1], [], []>} : vector<16x32xf32>, vector<32x64xf32>, vector<16x64xf32> -> vector<16x64xf32>
    %87 = vector.broadcast %14 : vector<1x64xf32> to vector<16x64xf32>
    %88 = arith.addf %86, %87 : vector<16x64xf32>
    %89 = arith.mulf %88, %88 : vector<16x64xf32>
    %90 = arith.mulf %88, %89 : vector<16x64xf32>
    %cst_35 = arith.constant 4.471500e-02 : f32
    %91 = vector.broadcast %cst_35 : f32 to vector<16x64xf32>
    %92 = arith.mulf %91, %90 : vector<16x64xf32>
    %93 = arith.addf %88, %92 : vector<16x64xf32>
    %cst_36 = arith.constant 0.797884583 : f32
    %94 = vector.broadcast %cst_36 : f32 to vector<16x64xf32>
    %95 = arith.mulf %94, %93 : vector<16x64xf32>
    %96 = math.tanh %95 : vector<16x64xf32>
    %cst_37 = arith.constant 1.000000e+00 : f32
    %97 = vector.broadcast %cst_37 : f32 to vector<16x64xf32>
    %98 = arith.addf %97, %96 : vector<16x64xf32>
    %cst_38 = arith.constant 5.000000e-01 : f32
    %99 = vector.broadcast %cst_38 : f32 to vector<16x64xf32>
    %100 = arith.mulf %99, %98 : vector<16x64xf32>
    %101 = arith.mulf %88, %100 : vector<16x64xf32>
    %cst_39 = arith.constant dense<0.000000e+00> : vector<16x32xf32>
    %102 = tpu.matmul %101, %9, %cst_39 {dimension_numbers = #tpu.dot_dimension_numbers<[1], [0], [0], [1], [0, 0, 1, 1], [], []>} : vector<16x64xf32>, vector<64x32xf32>, vector<16x32xf32> -> vector<16x32xf32>
    %103 = vector.broadcast %15 : vector<1x32xf32> to vector<16x32xf32>
    %104 = arith.addf %102, %103 : vector<16x32xf32>
    %105 = arith.addf %85, %104 : vector<16x32xf32>
    %cst_40 = arith.constant dense<0.000000e+00> : vector<16xf32>
    %106 = vector.multi_reduction <add>, %105, %cst_40 [1] : vector<16x32xf32> to vector<16xf32>
    %107 = vector.shape_cast %106 : vector<16xf32> to vector<16x1xf32>
    %cst_41 = arith.constant 3.200000e+01 : f32
    %108 = vector.broadcast %cst_41 : f32 to vector<16x1xf32>
    %109 = arith.divf %107, %108 : vector<16x1xf32>
    %110 = vector.broadcast %109 : vector<16x1xf32> to vector<16x32xf32>
    %111 = arith.subf %105, %110 : vector<16x32xf32>
    %112 = arith.mulf %111, %111 : vector<16x32xf32>
    %cst_42 = arith.constant dense<0.000000e+00> : vector<16xf32>
    %113 = vector.multi_reduction <add>, %112, %cst_42 [1] : vector<16x32xf32> to vector<16xf32>
    %114 = vector.shape_cast %113 : vector<16xf32> to vector<16x1xf32>
    %cst_43 = arith.constant 3.200000e+01 : f32
    %115 = vector.broadcast %cst_43 : f32 to vector<16x1xf32>
    %116 = arith.divf %114, %115 : vector<16x1xf32>
    %117 = vector.broadcast %109 : vector<16x1xf32> to vector<16x32xf32>
    %118 = arith.subf %105, %117 : vector<16x32xf32>
    %cst_44 = arith.constant 9.99999996E-13 : f32
    %119 = vector.broadcast %cst_44 : f32 to vector<16x1xf32>
    %120 = arith.addf %116, %119 : vector<16x1xf32>
    %121 = math.rsqrt %120 : vector<16x1xf32>
    %122 = vector.broadcast %121 : vector<16x1xf32> to vector<16x32xf32>
    %123 = arith.mulf %118, %122 : vector<16x32xf32>
    %124 = vector.broadcast %18 : vector<1x32xf32> to vector<16x32xf32>
    %125 = arith.mulf %123, %124 : vector<16x32xf32>
    %126 = vector.broadcast %19 : vector<1x32xf32> to vector<16x32xf32>
    %127 = arith.addf %125, %126 : vector<16x32xf32>
    %c1 = arith.constant 1 : index
    %c0_45 = arith.constant 0 : index
    %c0_46 = arith.constant 0 : index
    %128 = vector.load %arg2[%c1, %c0_45, %c0_46] : memref<2x32x96xf32, #tpu.memory_space<vmem>>, vector<1x32x96xf32>
    %129 = vector.shape_cast %128 : vector<1x32x96xf32> to vector<32x96xf32>
    %c1_47 = arith.constant 1 : index
    %c0_48 = arith.constant 0 : index
    %c0_49 = arith.constant 0 : index
    %130 = vector.load %arg3[%c1_47, %c0_48, %c0_49] : memref<2x32x32xf32, #tpu.memory_space<vmem>>, vector<1x32x32xf32>
    %131 = vector.shape_cast %130 : vector<1x32x32xf32> to vector<32x32xf32>
    %c1_50 = arith.constant 1 : index
    %c0_51 = arith.constant 0 : index
    %c0_52 = arith.constant 0 : index
    %132 = vector.load %arg4[%c1_50, %c0_51, %c0_52] : memref<2x32x64xf32, #tpu.memory_space<vmem>>, vector<1x32x64xf32>
    %133 = vector.shape_cast %132 : vector<1x32x64xf32> to vector<32x64xf32>
    %c1_53 = arith.constant 1 : index
    %c0_54 = arith.constant 0 : index
    %c0_55 = arith.constant 0 : index
    %134 = vector.load %arg5[%c1_53, %c0_54, %c0_55] : memref<2x64x32xf32, #tpu.memory_space<vmem>>, vector<1x64x32xf32>
    %135 = vector.shape_cast %134 : vector<1x64x32xf32> to vector<64x32xf32>
    %c1_56 = arith.constant 1 : index
    %c0_57 = arith.constant 0 : index
    %c0_58 = arith.constant 0 : index
    %136 = vector.load %arg6[%c1_56, %c0_57, %c0_58] : memref<2x8x128xf32, #tpu.memory_space<vmem>>, vector<1x8x128xf32>
    %137 = vector.shape_cast %136 : vector<1x8x128xf32> to vector<8x128xf32>
    %138 = vector.extract_strided_slice %137 {offsets = [0, 0], sizes = [1, 96], strides = [1, 1]} : vector<8x128xf32> to vector<1x96xf32>
    %139 = vector.extract_strided_slice %137 {offsets = [1, 0], sizes = [1, 32], strides = [1, 1]} : vector<8x128xf32> to vector<1x32xf32>
    %140 = vector.extract_strided_slice %137 {offsets = [2, 0], sizes = [1, 64], strides = [1, 1]} : vector<8x128xf32> to vector<1x64xf32>
    %141 = vector.extract_strided_slice %137 {offsets = [3, 0], sizes = [1, 32], strides = [1, 1]} : vector<8x128xf32> to vector<1x32xf32>
    %142 = vector.extract_strided_slice %137 {offsets = [4, 0], sizes = [1, 32], strides = [1, 1]} : vector<8x128xf32> to vector<1x32xf32>
    %143 = vector.extract_strided_slice %137 {offsets = [5, 0], sizes = [1, 32], strides = [1, 1]} : vector<8x128xf32> to vector<1x32xf32>
    %144 = vector.extract_strided_slice %137 {offsets = [6, 0], sizes = [1, 32], strides = [1, 1]} : vector<8x128xf32> to vector<1x32xf32>
    %145 = vector.extract_strided_slice %137 {offsets = [7, 0], sizes = [1, 32], strides = [1, 1]} : vector<8x128xf32> to vector<1x32xf32>
    %cst_59 = arith.constant dense<0.000000e+00> : vector<16x96xf32>
    %146 = tpu.matmul %127, %129, %cst_59 {dimension_numbers = #tpu.dot_dimension_numbers<[1], [0], [0], [1], [0, 0, 1, 1], [], []>} : vector<16x32xf32>, vector<32x96xf32>, vector<16x96xf32> -> vector<16x96xf32>
    %147 = vector.broadcast %138 : vector<1x96xf32> to vector<16x96xf32>
    %148 = arith.addf %146, %147 : vector<16x96xf32>
    %149 = vector.extract_strided_slice %148 {offsets = [0, 0], sizes = [16, 16], strides = [1, 1]} : vector<16x96xf32> to vector<16x16xf32>
    %150 = vector.extract_strided_slice %148 {offsets = [0, 32], sizes = [16, 16], strides = [1, 1]} : vector<16x96xf32> to vector<16x16xf32>
    %151 = vector.extract_strided_slice %148 {offsets = [0, 64], sizes = [16, 16], strides = [1, 1]} : vector<16x96xf32> to vector<16x16xf32>
    %cst_60 = arith.constant dense<0.000000e+00> : vector<16x16xf32>
    %152 = tpu.matmul %149, %150, %cst_60 {dimension_numbers = #tpu.dot_dimension_numbers<[1], [1], [0], [0], [0, 0, 1, 0], [], []>} : vector<16x16xf32>, vector<16x16xf32>, vector<16x16xf32> -> vector<16x16xf32>
    %cst_61 = arith.constant 2.500000e-01 : f32
    %153 = vector.broadcast %cst_61 : f32 to vector<16x16xf32>
    %154 = arith.mulf %152, %153 : vector<16x16xf32>
    %155 = arith.addf %154, %1 : vector<16x16xf32>
    %cst_62 = arith.constant dense<0xFF800000> : vector<16xf32>
    %156 = vector.multi_reduction <maximumf>, %155, %cst_62 [1] : vector<16x16xf32> to vector<16xf32>
    %157 = vector.shape_cast %156 : vector<16xf32> to vector<16x1xf32>
    %158 = vector.broadcast %157 : vector<16x1xf32> to vector<16x16xf32>
    %159 = arith.subf %155, %158 : vector<16x16xf32>
    %160 = math.exp %159 : vector<16x16xf32>
    %cst_63 = arith.constant dense<0.000000e+00> : vector<16xf32>
    %161 = vector.multi_reduction <add>, %160, %cst_63 [1] : vector<16x16xf32> to vector<16xf32>
    %162 = vector.shape_cast %161 : vector<16xf32> to vector<16x1xf32>
    %163 = tpu.reciprocal %162 {approx = true} : vector<16x1xf32> -> vector<16x1xf32>
    %164 = vector.broadcast %163 : vector<16x1xf32> to vector<16x16xf32>
    %165 = arith.mulf %160, %164 : vector<16x16xf32>
    %cst_64 = arith.constant dense<0.000000e+00> : vector<16x16xf32>
    %166 = tpu.matmul %165, %151, %cst_64 {dimension_numbers = #tpu.dot_dimension_numbers<[1], [0], [0], [1], [0, 0, 1, 1], [], []>} : vector<16x16xf32>, vector<16x16xf32>, vector<16x16xf32> -> vector<16x16xf32>
    %167 = vector.extract_strided_slice %148 {offsets = [0, 16], sizes = [16, 16], strides = [1, 1]} : vector<16x96xf32> to vector<16x16xf32>
    %168 = vector.extract_strided_slice %148 {offsets = [0, 48], sizes = [16, 16], strides = [1, 1]} : vector<16x96xf32> to vector<16x16xf32>
    %169 = vector.extract_strided_slice %148 {offsets = [0, 80], sizes = [16, 16], strides = [1, 1]} : vector<16x96xf32> to vector<16x16xf32>
    %cst_65 = arith.constant dense<0.000000e+00> : vector<16x16xf32>
    %170 = tpu.matmul %167, %168, %cst_65 {dimension_numbers = #tpu.dot_dimension_numbers<[1], [1], [0], [0], [0, 0, 1, 0], [], []>} : vector<16x16xf32>, vector<16x16xf32>, vector<16x16xf32> -> vector<16x16xf32>
    %cst_66 = arith.constant 2.500000e-01 : f32
    %171 = vector.broadcast %cst_66 : f32 to vector<16x16xf32>
    %172 = arith.mulf %170, %171 : vector<16x16xf32>
    %173 = arith.addf %172, %1 : vector<16x16xf32>
    %cst_67 = arith.constant dense<0xFF800000> : vector<16xf32>
    %174 = vector.multi_reduction <maximumf>, %173, %cst_67 [1] : vector<16x16xf32> to vector<16xf32>
    %175 = vector.shape_cast %174 : vector<16xf32> to vector<16x1xf32>
    %176 = vector.broadcast %175 : vector<16x1xf32> to vector<16x16xf32>
    %177 = arith.subf %173, %176 : vector<16x16xf32>
    %178 = math.exp %177 : vector<16x16xf32>
    %cst_68 = arith.constant dense<0.000000e+00> : vector<16xf32>
    %179 = vector.multi_reduction <add>, %178, %cst_68 [1] : vector<16x16xf32> to vector<16xf32>
    %180 = vector.shape_cast %179 : vector<16xf32> to vector<16x1xf32>
    %181 = tpu.reciprocal %180 {approx = true} : vector<16x1xf32> -> vector<16x1xf32>
    %182 = vector.broadcast %181 : vector<16x1xf32> to vector<16x16xf32>
    %183 = arith.mulf %178, %182 : vector<16x16xf32>
    %cst_69 = arith.constant dense<0.000000e+00> : vector<16x16xf32>
    %184 = tpu.matmul %183, %169, %cst_69 {dimension_numbers = #tpu.dot_dimension_numbers<[1], [0], [0], [1], [0, 0, 1, 1], [], []>} : vector<16x16xf32>, vector<16x16xf32>, vector<16x16xf32> -> vector<16x16xf32>
    %185 = tpu.concatenate %166, %184 in 1 : vector<16x16xf32>, vector<16x16xf32> -> vector<16x32xf32>
    %cst_70 = arith.constant dense<0.000000e+00> : vector<16x32xf32>
    %186 = tpu.matmul %185, %131, %cst_70 {dimension_numbers = #tpu.dot_dimension_numbers<[1], [0], [0], [1], [0, 0, 1, 1], [], []>} : vector<16x32xf32>, vector<32x32xf32>, vector<16x32xf32> -> vector<16x32xf32>
    %187 = vector.broadcast %139 : vector<1x32xf32> to vector<16x32xf32>
    %188 = arith.addf %186, %187 : vector<16x32xf32>
    %189 = arith.addf %127, %188 : vector<16x32xf32>
    %cst_71 = arith.constant dense<0.000000e+00> : vector<16xf32>
    %190 = vector.multi_reduction <add>, %189, %cst_71 [1] : vector<16x32xf32> to vector<16xf32>
    %191 = vector.shape_cast %190 : vector<16xf32> to vector<16x1xf32>
    %cst_72 = arith.constant 3.200000e+01 : f32
    %192 = vector.broadcast %cst_72 : f32 to vector<16x1xf32>
    %193 = arith.divf %191, %192 : vector<16x1xf32>
    %194 = vector.broadcast %193 : vector<16x1xf32> to vector<16x32xf32>
    %195 = arith.subf %189, %194 : vector<16x32xf32>
    %196 = arith.mulf %195, %195 : vector<16x32xf32>
    %cst_73 = arith.constant dense<0.000000e+00> : vector<16xf32>
    %197 = vector.multi_reduction <add>, %196, %cst_73 [1] : vector<16x32xf32> to vector<16xf32>
    %198 = vector.shape_cast %197 : vector<16xf32> to vector<16x1xf32>
    %cst_74 = arith.constant 3.200000e+01 : f32
    %199 = vector.broadcast %cst_74 : f32 to vector<16x1xf32>
    %200 = arith.divf %198, %199 : vector<16x1xf32>
    %201 = vector.broadcast %193 : vector<16x1xf32> to vector<16x32xf32>
    %202 = arith.subf %189, %201 : vector<16x32xf32>
    %cst_75 = arith.constant 9.99999996E-13 : f32
    %203 = vector.broadcast %cst_75 : f32 to vector<16x1xf32>
    %204 = arith.addf %200, %203 : vector<16x1xf32>
    %205 = math.rsqrt %204 : vector<16x1xf32>
    %206 = vector.broadcast %205 : vector<16x1xf32> to vector<16x32xf32>
    %207 = arith.mulf %202, %206 : vector<16x32xf32>
    %208 = vector.broadcast %142 : vector<1x32xf32> to vector<16x32xf32>
    %209 = arith.mulf %207, %208 : vector<16x32xf32>
    %210 = vector.broadcast %143 : vector<1x32xf32> to vector<16x32xf32>
    %211 = arith.addf %209, %210 : vector<16x32xf32>
    %cst_76 = arith.constant dense<0.000000e+00> : vector<16x64xf32>
    %212 = tpu.matmul %211, %133, %cst_76 {dimension_numbers = #tpu.dot_dimension_numbers<[1], [0], [0], [1], [0, 0, 1, 1], [], []>} : vector<16x32xf32>, vector<32x64xf32>, vector<16x64xf32> -> vector<16x64xf32>
    %213 = vector.broadcast %140 : vector<1x64xf32> to vector<16x64xf32>
    %214 = arith.addf %212, %213 : vector<16x64xf32>
    %215 = arith.mulf %214, %214 : vector<16x64xf32>
    %216 = arith.mulf %214, %215 : vector<16x64xf32>
    %cst_77 = arith.constant 4.471500e-02 : f32
    %217 = vector.broadcast %cst_77 : f32 to vector<16x64xf32>
    %218 = arith.mulf %217, %216 : vector<16x64xf32>
    %219 = arith.addf %214, %218 : vector<16x64xf32>
    %cst_78 = arith.constant 0.797884583 : f32
    %220 = vector.broadcast %cst_78 : f32 to vector<16x64xf32>
    %221 = arith.mulf %220, %219 : vector<16x64xf32>
    %222 = math.tanh %221 : vector<16x64xf32>
    %cst_79 = arith.constant 1.000000e+00 : f32
    %223 = vector.broadcast %cst_79 : f32 to vector<16x64xf32>
    %224 = arith.addf %223, %222 : vector<16x64xf32>
    %cst_80 = arith.constant 5.000000e-01 : f32
    %225 = vector.broadcast %cst_80 : f32 to vector<16x64xf32>
    %226 = arith.mulf %225, %224 : vector<16x64xf32>
    %227 = arith.mulf %214, %226 : vector<16x64xf32>
    %cst_81 = arith.constant dense<0.000000e+00> : vector<16x32xf32>
    %228 = tpu.matmul %227, %135, %cst_81 {dimension_numbers = #tpu.dot_dimension_numbers<[1], [0], [0], [1], [0, 0, 1, 1], [], []>} : vector<16x64xf32>, vector<64x32xf32>, vector<16x32xf32> -> vector<16x32xf32>
    %229 = vector.broadcast %141 : vector<1x32xf32> to vector<16x32xf32>
    %230 = arith.addf %228, %229 : vector<16x32xf32>
    %231 = arith.addf %211, %230 : vector<16x32xf32>
    %cst_82 = arith.constant dense<0.000000e+00> : vector<16xf32>
    %232 = vector.multi_reduction <add>, %231, %cst_82 [1] : vector<16x32xf32> to vector<16xf32>
    %233 = vector.shape_cast %232 : vector<16xf32> to vector<16x1xf32>
    %cst_83 = arith.constant 3.200000e+01 : f32
    %234 = vector.broadcast %cst_83 : f32 to vector<16x1xf32>
    %235 = arith.divf %233, %234 : vector<16x1xf32>
    %236 = vector.broadcast %235 : vector<16x1xf32> to vector<16x32xf32>
    %237 = arith.subf %231, %236 : vector<16x32xf32>
    %238 = arith.mulf %237, %237 : vector<16x32xf32>
    %cst_84 = arith.constant dense<0.000000e+00> : vector<16xf32>
    %239 = vector.multi_reduction <add>, %238, %cst_84 [1] : vector<16x32xf32> to vector<16xf32>
    %240 = vector.shape_cast %239 : vector<16xf32> to vector<16x1xf32>
    %cst_85 = arith.constant 3.200000e+01 : f32
    %241 = vector.broadcast %cst_85 : f32 to vector<16x1xf32>
    %242 = arith.divf %240, %241 : vector<16x1xf32>
    %243 = vector.broadcast %235 : vector<16x1xf32> to vector<16x32xf32>
    %244 = arith.subf %231, %243 : vector<16x32xf32>
    %cst_86 = arith.constant 9.99999996E-13 : f32
    %245 = vector.broadcast %cst_86 : f32 to vector<16x1xf32>
    %246 = arith.addf %242, %245 : vector<16x1xf32>
    %247 = math.rsqrt %246 : vector<16x1xf32>
    %248 = vector.broadcast %247 : vector<16x1xf32> to vector<16x32xf32>
    %249 = arith.mulf %244, %248 : vector<16x32xf32>
    %250 = vector.broadcast %144 : vector<1x32xf32> to vector<16x32xf32>
    %251 = arith.mulf %249, %250 : vector<16x32xf32>
    %252 = vector.broadcast %145 : vector<1x32xf32> to vector<16x32xf32>
    %253 = arith.addf %251, %252 : vector<16x32xf32>
    %c0_87 = arith.constant 0 : index
    %c0_88 = arith.constant 0 : index
    %254 = vector.load %arg7[%c0_87, %c0_88] : memref<16x32xf32, #tpu.memory_space<vmem>>, vector<16x32xf32>
    tpu.vector_store %arg7[%c0_87, %c0_88], %253 {strides = array<i32>} : memref<16x32xf32, #tpu.memory_space<vmem>>, vector<16x32xf32>,
    return
  }
}

</mosaic_0001>

<bundles_post_ra>
// kernel: bert_document_embedder.3
= control target key start
LH: loop header
LB: loop body
LE: loop exit
PB: predicated region body
PF: predicated region fallthrough
CT: control target
= control target key end

     0   :  { %v417_v2 = vmov 0   ;;  %s523_s0 = inlined_call_operand.vmem [shape: f32[16,32], index: 0, kind: input, shape index: {}]   ;;  %s524_s1 = inlined_call_operand.vmem [shape: s32[3,1], index: 1, kind: input, shape index: {}]   ;;  %s525_s2 = inlined_call_operand.vmem [shape: s32[3,1], index: 2, kind: input, shape index: {}]   ;;  %s526_s3 = inlined_call_operand.vmem [shape: f32[32,16], index: 3, kind: input, shape index: {}]   ;;  %s527_s4 = inlined_call_operand.vmem [shape: f32[1,16], index: 4, kind: input, shape index: {}]   ;;  %s528_s5 = inlined_call_operand.vmem [shape: f32[16,4], index: 5, kind: input, shape index: {}]   ;;  %s529_s6 = inlined_call_operand.vmem [shape: f32[1,4], index: 6, kind: input, shape index: {}]   ;;  %s530_s7 = inlined_call_operand.vmem [shape: f32[5,16], index: 7, kind: output, shape index: {0}]   ;;  %s531_s8 = inlined_call_operand.hbm [shape: f32[3,4], index: 8, kind: output, shape index: {1}]  }
   0x1   :  { %v31_v0 = vld [vmem:[%s524_s1] sm:$0x7]  ;;  %389 = vset.pattern.permute.xlu0 %v417_v2  ;;  %390 = vset.pattern.permute.xlu1 %v417_v2 }
   0x2   :  { %v32_v1 = vld [vmem:[%s525_s2] sm:$0x7] }
   0x3   :  { %v46_v3 = vsub.s32 %v32_v1, %v31_v0 }
   0x4   :  { %14 = vsyncpa [#allocation3], 0  ;;  %36 = vperm.xlu0 %389, %v31_v0   ;;  %v418_v6 = vmov 0.0|0.0   ;;  %v29_v7 = vld [vmem:[%s523_s0] sm:$0xff]  ;;  %v30_v8 = vld [vmem:[%s523_s0 + $0x8] sm:$0xff]  ;;  %vm133_vm0 = vcmask 1040384   ;;  %v33_v18 = vlaneseq }
   0x5   :  { %v47_v4 = vadd.s32 1, %v46_v3  ;;  %372 = vmatprep.subr.bf16.mxu0 %v418_v6  ;;  %375 = vmatprep.subr.bf16.mxu1 %v418_v6  ;;  %v373_v9 = vpack.c.bf16 %v30_v8, %v29_v7  ;;  %v131_v11 = vrot.slane %v30_v8, 7  ;;  %vm419_vm1 = vmmov 0   ;;  %v140_v14 = vld [vmem:[%s526_s3] sm:$0xff]  ;;  %v141_v15 = vld [vmem:[%s526_s3 + $0x8] sm:$0xff]  ;;  %v142_v24 = vld [vmem:[%s526_s3 + $0x10] sm:$0xff] }
   0x6   :  { %v420_v12 = vmov 0.0   ;;  %v376_v16 = vpack.c.bf16 %v141_v15, %v140_v14  ;;  %v34_v19 = vand.u32 127, %v33_v18  ;;  %vm56_vm5 = vcmask 130048   ;;  %v143_v25 = vld [vmem:[%s526_s3 + $0x18] sm:$0xff]  ;;  %v227_v31 = vld [vmem:[%s528_s5] sm:$0xff]  ;;  %v228_v32 = vld [vmem:[%s528_s5 + $0x8] sm:$0xff] }
   0x7   :  { %v48_v5 = vcvt.s32.f32 %v47_v4  ;;  %374 = vmatpush3.bf16.msra.mxu0 %v373_v9  ;;  %351 = vmatprep.mubr.msk.f32.mxu0 %vm419_vm1, %v420_v12  ;;  %v134_v13 = vsel %vm133_vm0, %v29_v7, %v131_v11  ;;  %v379_v26 = vpack.c.bf16 %v143_v25, %v142_v24  ;;  %vm138_vm6 = vcmask 1041408   ;;  %v332_v34 = vld [vmem:[%s527_s4] ss:$0 sm:$0xff]  ;;  %s421_s5 = smov [#allocation2]  }
   0x8   :  { %40 = vperm.xlu0 %389, %v32_v1   ;;  %381 = vmatprep.subr.bf16.mxu0 %v418_v6  ;;  %vm151_vm7 = vcmask 261120   ;;  %v382_v33 = vpack.c.bf16 %v228_v32, %v227_v31  ;;  %vm225_vm8 = vcmask 126976   ;;  %v334_v39 = vld [vmem:[%s529_s6] ss:$0 sm:$0xff]  ;;  %s320_s27 = sshll.u32 %s421_s5, 4  ;;  %vm310_vm9 = vcmask 26624   ;;  %s321_s27 = int_to_ptr.vmem [resolvable:$true] %s320_s27 }
   0x9   :  { %391 = vrcp.f32 %v48_v5  ;;  %362 = vmatprep.mubr.msk.f32.mxu1 %vm419_vm1, %v420_v12  ;;  %377 = vmatpush3.bf16.msra.mxu1 %v376_v16  ;;  %s393_s4 = scalar_lea.vmem %s321_s27, 64  ;;  %p398_p1 = scmp.lt.s32.totalorder %s321_s27, %s321_s27 }
   0xa   :  { %378 = vmatprep.subr.bf16.mxu1 %v418_v6  ;;  %p394_p0 = scmp.ne.s32.totalorder %s321_s27, %s393_s4  ;;  %p399_p2 = scmp.lt.s32.totalorder %s393_s4, %s393_s4 }
   0xc   :  { %p400_p3 = por %p399_p2, %p398_p1 }
   0xd   :  { %380 = vmatpush3.bf16.msra.mxu1 %v379_v26 }
   0xe   :  { %p401_p4 = pnand %p400_p3, %p394_p0 }
  0x13   :  { %v392_v10 = vpop.eup %391 }
  0x14   :  { %52 = vperm.xlu1 %390, %v392_v10  }
  0x83   :  { %v37_v17 = vpop.permute.xlu0 %36 }
  0x84   :  { %vm38_vm2 = vcmp.ge.s32.totalorder %v34_v19, %v37_v17 }
  0x87   :  { %v41_v20 = vpop.permute.xlu0 %40 }
  0x88   :  { %vm42_vm3 = vcmp.le.s32.totalorder %v34_v19, %v41_v20 }
  0x89   :  { %vm43_vm4 = vmand %vm38_vm2, %vm42_vm3 }
  0x8a   :  { %v330_v21 = vsel %vm43_vm4, 1.0, %v420_v12 }
  0x93   :  { %v53_v22 = vpop.permute.xlu1 %52 }
  0x94   :  { %v55_v23 = vmul.f32 %v330_v21, %v53_v22 }
  0x96   :  { %352 = vmatmul.mubr.msk.f32.vlgmr.msra.gmra.mrb[0].mxu0 %vm56_vm5, %v55_v23 }
  0x97   :  { %369 = vmatprep.mubr.msk.f32.mxu0 %vm419_vm1, %v420_v12  ;;  %383 = vmatpush3.bf16.msra.mxu0 %v382_v33 }
 0x169   :  { %v126_v27 = vpop.f32.mrb[0].mxu0 }
 0x16a   :  { %v136_v28 = vrot.slane %v126_v27, 6  ;;  %v353_v29 = vpop.f32.mrb[1].mxu0 }
 0x16c   :  { %v139_v30 = vsel %vm138_vm6, %v134_v13, %v136_v28 }
 0x16d   :  { %363 = vmatmul.mubr.msk.f32.vlgmr.msra.gmra.mrb[0].mxu1 %vm151_vm7, %v139_v30 }
 0x240   :  { %v221_v35 = vpop.f32.mrb[0].mxu1 }
 0x241   :  { %v222_v36 = vadd.f32 %v332_v34, %v221_v35  ;;  %v364_v37 = vpop.f32.mrb[1].mxu1 }
 0x243   :  { %226 = vst.msk [vmem:[%s530_s7] sm:$0x1f] %vm225_vm8, %v222_v36  ;;  %v237_v38 = vrot.slane %v222_v36, 2 }
 0x245   :  { %370 = vmatmul.mubr.msk.f32.vlgmr.msra.gmra.mrb[2].mxu0 %vm56_vm5, %v237_v38 }
 0x318   :  { %v306_v40 = vpop.f32.mrb[2].mxu0 }
 0x319   :  { %v307_v41 = vadd.f32 %v334_v39, %v306_v40  ;;  %v371_v42 = vpop.f32.mrb[3].mxu0 }
 0x31b   :  { %311 = vst.msk [vmem:[#allocation2] sm:$0x7] %vm310_vm9, %v307_v41 }
 0x31c   :  { %404 = shalt.err (!%p401_p4)
}
 0x31d   :  { %s405_s29 = scalar_lea.hbm %s531_s8, 64 }
 0x31e   :  { %p406_p5 = scmp.ne.s32.totalorder %s531_s8, %s405_s29  ;;  %p409_p6 = scmp.lt.u32.totalorder %s405_s29, %s531_s8 }
 0x320   :  { %p411_p7 = pnand %p409_p6, %p406_p5 }
 0x322   :  { %414 = shalt.err (!%p411_p7)
}
 0x323   :  { %323 = dma.vmem_to_hbm [thread:$0]  %s321_s27, 64, %s531_s8, [#allocation3]  }
 0x324   :  { %415 = dma.done.wait [#allocation3], 64  }
 0x325   :  { %416 = vsyncadd [#allocation3], 4294967232 }
 0x326   :  { %329 = vsyncpa [#allocation3], 1 }

// kernel: bert_document_embedder.2
= control target key start
LH: loop header
LB: loop body
LE: loop exit
PB: predicated region body
PF: predicated region fallthrough
CT: control target
= control target key end

     0   :  { %vm55_vm0 = vcmask 261120   ;;  %v51_v8 = vlaneseq  ;;  %vm143_vm1 = vcmask 130048   ;;  %s2327_s15 = smov 96   ;;  %s2328_s16 = smov 80   ;;  %vm787_vm3 = vcmask 523264   ;;  %s2726_s2 = inlined_call_operand.vmem [shape: f32[2,32,96], index: 2, kind: input, shape index: {}]   ;;  %s2727_s0 = inlined_call_operand.vmem [shape: f32[16,32], index: 0, kind: input, shape index: {}]   ;;  %s2728_s6 = inlined_call_operand.vmem [shape: f32[2,8,128], index: 6, kind: input, shape index: {}]   ;;  %s2729_s1 = inlined_call_operand.vmem [shape: f32[16,16], index: 1, kind: input, shape index: {}]   ;;  %s2730_s3 = inlined_call_operand.vmem [shape: f32[2,32,32], index: 3, kind: input, shape index: {}]   ;;  %s2731_s4 = inlined_call_operand.vmem [shape: f32[2,32,64], index: 4, kind: input, shape index: {}]   ;;  %s2732_s5 = inlined_call_operand.vmem [shape: f32[2,64,32], index: 5, kind: input, shape index: {}]   ;;  %s2733_s7 = inlined_call_operand.vmem [shape: f32[16,32], index: 7, kind: output, shape index: {}]  }
   0x1   :  { %v30_v0 = vld [vmem:[%s2726_s2] sm:$0xff]  ;;  %v31_v1 = vld [vmem:[%s2726_s2 + $0x8] sm:$0xff]  ;;  %v32_v2 = vld [vmem:[%s2726_s2 + $0x10] sm:$0xff]  ;;  %s2330_s21 = smov 48   ;;  %s2331_s30 = smov 16  }
   0x2   :  { %v2104_v3 = vpack.c.bf16 %v31_v1, %v30_v0  ;;  %v33_v4 = vld [vmem:[%s2726_s2 + $0x18] sm:$0xff]  ;;  %v2387_v5 = vld [vmem:[%s2727_s0] sm:$0xff]  ;;  %v2394_v7 = vld [vmem:[%s2727_s0 + $0x8] sm:$0xff]  ;;  %v2398_v9 = vshrl.u32 %v51_v8, 7  ;;  %s2326_s0 = smov 112  }
   0x3   :  { %v2108_v6 = vpack.c.bf16 %v33_v4, %v32_v2  ;;  %1952 = vmatprep.mubr.msk.f32.mxu1 %vm55_vm0, %v2387_v5  ;;  %v2404_v11 = vld [vmem:[%s2728_s6] sm:$0xff]  ;;  %vm2420_vm2 = vmpackc.low %vm143_vm1, %vm143_vm1  ;;  %v2438_v30 = vld [vmem:[%s2729_s1 + $0x8] sm:$0xff] }
   0x4   :  { %2105 = vmatprep.subr.bf16.mxu1 %v2104_v3  ;;  %v53_v10 = vsub.s32 0, %v2398_v9  ;;  %v2443_v33 = vld [vmem:[%s2729_s1] sm:$0xff]  ;;  %s2329_s1 = smov 64  }
   0x5   :  { %2107 = vmatpush3.bf16.msra.mxu1 %v2104_v3 }
   0x6   :  { %2109 = vmatprep.subr.bf16.mxu1 %v2108_v6  ;;  %v54_v12 = vrot.slane %v2404_v11, %v53_v10 }
   0x9   :  { %2111 = vmatpush3.bf16.msra.mxu1 %v2108_v6 }
   0xc   :  { %1953 = vmatmul.mubr.msk.f32.vlgmr.msra.gmra.mrb[0].mxu1 %vm55_vm0, %v2394_v7 }
  0xdf   :  { %v1954_v13 = vpop.f32.mrb[0].mxu1 }
  0xe0   :  { %v134_v14 = vadd.f32 %v1954_v13, %v54_v12  ;;  %v128_v15 = vpop.f32.mrb[1].mxu1 }
  0xe1   :  { %v129_v16 = vadd.f32 %v128_v15, %v54_v12 }
  0xe3   :  { %340 = vrot.lane.b32.xlu1 %v129_v16, %s2326_s0  ;;  %1959 = vmatprep.mubr.msk.f32.mxu1 %vm143_vm1, %v129_v16  ;;  %v2411_v17 = vpack.i.bf16 %v134_v14, %v129_v16 }
  0xe5   :  { %2231 = vrot.lane.b32.xlu0 %v2411_v17, %s2327_s15 }
  0xe7   :  { %342 = vrot.lane.b32.xlu1 %v134_v14, %s2326_s0 }
  0xe9   :  { %2236 = vrot.lane.b32.xlu0 %v2411_v17, %s2328_s16 }
 0x155   :  { %v341_v27 = vpop.permute.xlu1 %340 }
 0x157   :  { %v2232_v18 = vpop.permute.xlu0 %2231 }
 0x158   :  { %v2234_v19 = vunpack.i.h.bf16 %v2232_v18  ;;  %v2233_v20 = vunpack.i.l.bf16 %v2232_v18 }
 0x159   :  { %v343_v28 = vpop.permute.xlu1 %342 }
 0x15a   :  { %v2112_v22 = vpack.c.bf16 %v2234_v19, %v2233_v20 }
 0x15b   :  { %v2237_v23 = vpop.permute.xlu0 %2236 }
 0x15c   :  { %v2239_v24 = vunpack.i.h.bf16 %v2237_v23  ;;  %v2238_v25 = vunpack.i.l.bf16 %v2237_v23  ;;  %2114 = vmatprep.subr.msk.bf16.mxu1 %vm2420_vm2, %v2112_v22 }
 0x15d   :  { %2117 = vmatpush3.bf16.xpose.msk.msra.mxu1 %vm2420_vm2, %v2112_v22 }
 0x15e   :  { %v2122_v26 = vpack.c.bf16 %v2239_v24, %v2238_v25 }
 0x160   :  { %2124 = vmatprep.subr.msk.bf16.mxu1 %vm2420_vm2, %v2122_v26 }
 0x164   :  { %1960 = vmatmul.mubr.msk.f32.vlgmr.msra.gmra.mrb[2].mxu1 %vm143_vm1, %v134_v14 }
 0x165   :  { %2127 = vmatpush3.bf16.xpose.msk.msra.mxu1 %vm2420_vm2, %v2122_v26  ;;  %1973 = vmatprep.mubr.msk.f32.mxu1 %vm143_vm1, %v341_v27 }
 0x16c   :  { %1974 = vmatmul.mubr.msk.f32.vlgmr.msra.gmra.mrb[4].mxu1 %vm143_vm1, %v343_v28 }
 0x237   :  { %v1961_v29 = vpop.f32.mrb[2].mxu1 }
 0x238   :  { %v228_v31 = vmul.f32 0.25, %v1961_v29  ;;  %v218_v32 = vpop.f32.mrb[3].mxu1  ;;  %v34_v29 = vld [vmem:[%s2730_s3] sm:$0xff] }
 0x239   :  { %v227_v34 = vmul.f32 0.25, %v218_v32 }
 0x23a   :  { %v230_v35 = vadd.f32 %v228_v31, %v2438_v30  ;;  %v35_v31 = vld [vmem:[%s2730_s3 + $0x8] sm:$0xff] }
 0x23b   :  { %v229_v36 = vadd.f32 %v227_v34, %v2443_v33  ;;  %v2132_v32 = vpack.c.bf16 %v35_v31, %v34_v29  ;;  %v36_v34 = vld [vmem:[%s2730_s3 + $0x10] sm:$0xff]  ;;  %v42_v29 = vld [vmem:[%s2732_s5] sm:$0xff]  ;;  %v43_v31 = vld [vmem:[%s2732_s5 + $0x8] sm:$0xff] }
 0x23c   :  { %v234_v37 = vsel %vm143_vm1, %v230_v35, -inf }
 0x23d   :  { %235 = vmax.xlane.f32.xlu1 %v234_v37  ;;  %v231_v38 = vsel %vm143_vm1, %v229_v36, -inf }
 0x23e   :  { %232 = vmax.xlane.f32.xlu0 %v231_v38 }
 0x23f   :  { %v1975_v39 = vpop.f32.mrb[4].mxu1 }
 0x240   :  { %v422_v40 = vpop.f32.mrb[5].mxu1  ;;  %v432_v41 = vmul.f32 0.25, %v1975_v39 }
 0x241   :  { %v431_v42 = vmul.f32 0.25, %v422_v40 }
 0x242   :  { %v434_v45 = vadd.f32 %v432_v41, %v2438_v30 }
 0x243   :  { %v433_v43 = vadd.f32 %v431_v42, %v2443_v33 }
 0x244   :  { %v438_v46 = vsel %vm143_vm1, %v434_v45, -inf }
 0x245   :  { %v435_v44 = vsel %vm143_vm1, %v433_v43, -inf }
 0x246   :  { %436 = vmax.xlane.f32.xlu0 %v435_v44 }
 0x24a   :  { %439 = vmax.xlane.f32.xlu0 %v438_v46 }
 0x2ca   :  { %v236_v47 = vpop.xlane.xlu1 %235 }
 0x2cb   :  { %v238_v48 = vsub.f32 %v230_v35, %v236_v47  ;;  %v233_v49 = vpop.xlane.xlu0 %232  ;;  %v37_v35 = vld [vmem:[%s2730_s3 + $0x18] sm:$0xff] }
 0x2cc   :  { %v237_v50 = vsub.f32 %v229_v36, %v233_v49  ;;  %v2136_v36 = vpack.c.bf16 %v37_v35, %v36_v34  ;;  %v44_v34 = vld [vmem:[%s2732_s5 + $0x10] sm:$0xff]  ;;  %v45_v35 = vld [vmem:[%s2732_s5 + $0x18] sm:$0xff] }
 0x2cd   :  { %v241_v51 = vmul.f32 1.442695, %v238_v48 }
 0x2ce   :  { %v239_v52 = vmul.f32 1.442695, %v237_v50 }
 0x2cf   :  { %2270 = vpow2.f32 %v241_v51 }
 0x2d0   :  { %2272 = vpow2.f32 %v239_v52 }
 0x2d3   :  { %v437_v53 = vpop.xlane.xlu0 %436 }
 0x2d4   :  { %v441_v54 = vsub.f32 %v433_v43, %v437_v53 }
 0x2d6   :  { %v443_v55 = vmul.f32 1.442695, %v441_v54 }
 0x2d7   :  { %v440_v56 = vpop.xlane.xlu0 %439 }
 0x2d8   :  { %2274 = vpow2.f32 %v443_v55  ;;  %v442_v57 = vsub.f32 %v434_v45, %v440_v56  ;;  %v556_v45 = vsub.s32 1, %v2398_v9 }
 0x2d9   :  { %v2271_v58 = vpop.eup %2270 }
 0x2da   :  { %v2273_v59 = vpop.eup %2272  ;;  %v445_v60 = vmul.f32 1.442695, %v442_v57  ;;  %v246_v61 = vsel %vm143_vm1, %v2271_v58, 0.0  ;;  %v557_v46 = vrot.slane %v2404_v11, %v556_v45 }
 0x2db   :  { %247 = vadd.xlane.f32.xlu0 %v246_v61  ;;  %v243_v62 = vsel %vm143_vm1, %v2273_v59, 0.0 }
 0x2dc   :  { %2276 = vpow2.f32 %v445_v60  ;;  %244 = vadd.xlane.f32.xlu1 %v243_v62 }
 0x2e2   :  { %v2275_v63 = vpop.eup %2274 }
 0x2e3   :  { %v447_v0 = vsel %vm143_vm1, %v2275_v63, 0.0 }
 0x2e4   :  { %448 = vadd.xlane.f32.xlu1 %v447_v0  ;;  %v39_v0 = vld [vmem:[%s2731_s4 + $0x8] sm:$0xff] }
 0x2e6   :  { %v2277_v1 = vpop.eup %2276 }
 0x2e7   :  { %v450_v2 = vsel %vm143_vm1, %v2277_v1, 0.0 }
 0x2e8   :  { %451 = vadd.xlane.f32.xlu0 %v450_v2  ;;  %v40_v2 = vld [vmem:[%s2731_s4 + $0x10] sm:$0xff] }
 0x2f5   :  { %2241 = vrot.lane.b32.xlu1 %v2411_v17, %s2329_s1 }
 0x2fe   :  { %2246 = vrot.lane.b32.xlu0 %v2411_v17, %s2330_s21 }
 0x368   :  { %v248_v4 = vpop.xlane.xlu0 %247 }
 0x369   :  { %v245_v3 = vpop.xlane.xlu1 %244 }
 0x36a   :  { %2278 = vrcp.f32 %v245_v3  ;;  %v41_v3 = vld [vmem:[%s2731_s4 + $0x18] sm:$0xff] }
 0x36b   :  { %2280 = vrcp.f32 %v248_v4  ;;  %v2144_v4 = vpack.c.bf16 %v41_v3, %v40_v2  ;;  %v785_v2 = vsub.s32 3, %v2398_v9 }
 0x36d   :  { %v786_v3 = vrot.slane %v2404_v11, %v785_v2 }
 0x371   :  { %v449_v6 = vpop.xlane.xlu1 %448 }
 0x372   :  { %2282 = vrcp.f32 %v449_v6 }
 0x374   :  { %v2279_v8 = vpop.eup %2278 }
 0x375   :  { %v2242_v12 = vpop.permute.xlu1 %2241  ;;  %v452_v13 = vpop.xlane.xlu0 %451  ;;  %v251_v14 = vmul.f32 %v2279_v8, %v2273_v59 }
 0x376   :  { %v2244_v15 = vunpack.i.h.bf16 %v2242_v12  ;;  %v2243_v16 = vunpack.i.l.bf16 %v2242_v12  ;;  %2284 = vrcp.f32 %v452_v13  ;;  %v2281_v19 = vpop.eup %2280 }
 0x377   :  { %1966 = vmatprep.mubr.msk.f32.mxu0 %vm143_vm1, %v251_v14  ;;  %v252_v25 = vmul.f32 %v2281_v19, %v2271_v58 }
 0x378   :  { %v2118_v18 = vpack.c.bf16 %v2244_v15, %v2243_v16  ;;  %v670_v16 = vsub.s32 4, %v2398_v9 }
 0x379   :  { %v2247_v20 = vpop.permute.xlu0 %2246 }
 0x37a   :  { %v2249_v22 = vunpack.i.h.bf16 %v2247_v20  ;;  %v2248_v17 = vunpack.i.l.bf16 %v2247_v20  ;;  %2119 = vmatprep.subr.bf16.mxu0 %v2118_v18  ;;  %v671_v19 = vrot.slane %v2404_v11, %v670_v16 }
 0x37b   :  { %2121 = vmatpush3.bf16.msra.mxu0 %v2118_v18  ;;  %v676_v18 = vsub.s32 5, %v2398_v9 }
 0x37c   :  { %v2283_v23 = vpop.eup %2282  ;;  %v2128_v24 = vpack.c.bf16 %v2249_v22, %v2248_v17 }
 0x37d   :  { %v455_v26 = vmul.f32 %v2283_v23, %v2275_v63  ;;  %v677_v17 = vrot.slane %v2404_v11, %v676_v18 }
 0x37e   :  { %1967 = vmatmul.mubr.msk.f32.vlgmr.msra.gmra.mrb[0].mxu0 %vm143_vm1, %v252_v25  ;;  %2129 = vmatprep.subr.bf16.mxu0 %v2128_v24 }
 0x37f   :  { %2131 = vmatpush3.bf16.msra.mxu0 %v2128_v24  ;;  %1980 = vmatprep.mubr.msk.f32.mxu0 %vm143_vm1, %v455_v26 }
 0x380   :  { %v2285_v27 = vpop.eup %2284  ;;  %2133 = vmatprep.subr.bf16.mxu0 %v2132_v32 }
 0x381   :  { %v456_v28 = vmul.f32 %v2285_v27, %v2277_v1 }
 0x383   :  { %1981 = vmatmul.mubr.msk.f32.vlgmr.msra.gmra.mrb[2].mxu0 %vm143_vm1, %v456_v28 }
 0x384   :  { %2135 = vmatpush3.bf16.msra.mxu0 %v2132_v32  ;;  %v2148_v32 = vpack.c.bf16 %v43_v31, %v42_v29 }
 0x385   :  { %2137 = vmatprep.subr.bf16.mxu0 %v2136_v36 }
 0x388   :  { %2139 = vmatpush3.bf16.msra.mxu0 %v2136_v36  ;;  %v2152_v36 = vpack.c.bf16 %v45_v35, %v44_v34  ;;  %v1817_v35 = vld [vmem:[%s2726_s2 + $0x30] sm:$0xff] }
 0x389   :  { %2149 = vmatprep.subr.bf16.mxu0 %v2148_v32 }
 0x451   :  { %v1968_v37 = vpop.f32.mrb[0].mxu0 }
 0x452   :  { %v331_v38 = vpop.f32.mrb[1].mxu0 }
 0x456   :  { %v1982_v39 = vpop.f32.mrb[2].mxu0 }
 0x457   :  { %v535_v40 = vpop.f32.mrb[3].mxu0 }
 0x458   :  { %546 = vrot.lane.b32.xlu1 %v535_v40, %s2331_s30  ;;  %v48_v40 = vld [vmem:[%s2732_s5 + $0x30] sm:$0xff] }
 0x45c   :  { %548 = vrot.lane.b32.xlu1 %v1982_v39, %s2331_s30 }
 0x4ca   :  { %v547_v41 = vpop.permute.xlu1 %546 }
 0x4cb   :  { %v552_v42 = vsel %vm143_vm1, %v331_v38, %v547_v41  ;;  %v47_v38 = vld [vmem:[%s2732_s5 + $0x28] sm:$0xff]  ;;  %v49_v41 = vld [vmem:[%s2732_s5 + $0x38] sm:$0xff] }
 0x4cc   :  { %1991 = vmatprep.mubr.msk.f32.mxu0 %vm55_vm0, %v552_v42  ;;  %v2160_v42 = vpack.c.bf16 %v49_v41, %v48_v40 }
 0x4ce   :  { %v549_v43 = vpop.permute.xlu1 %548 }
 0x4cf   :  { %v553_v44 = vsel %vm143_vm1, %v1968_v37, %v549_v43  ;;  %v46_v37 = vld [vmem:[%s2732_s5 + $0x20] sm:$0xff]  ;;  %v682_v43 = vsub.s32 2, %v2398_v9 }
 0x4d0   :  { %1992 = vmatmul.mubr.msk.f32.vlgmr.msra.gmra.mrb[4].mxu0 %vm55_vm0, %v553_v44  ;;  %v2156_v39 = vpack.c.bf16 %v47_v38, %v46_v37 }
 0x4d1   :  { %2151 = vmatpush3.bf16.msra.mxu0 %v2148_v32  ;;  %v683_v44 = vrot.slane %v2404_v11, %v682_v43  ;;  %v1816_v32 = vld [vmem:[%s2726_s2 + $0x28] sm:$0xff] }
 0x4d2   :  { %2153 = vmatprep.subr.bf16.mxu0 %v2152_v36 }
 0x4d5   :  { %2155 = vmatpush3.bf16.msra.mxu0 %v2152_v36  ;;  %v1818_v36 = vld [vmem:[%s2726_s2 + $0x38] sm:$0xff] }
 0x4d6   :  { %2157 = vmatprep.subr.bf16.mxu0 %v2156_v39  ;;  %v2168_v37 = vpack.c.bf16 %v1818_v36, %v1817_v35 }
 0x4d9   :  { %2159 = vmatpush3.bf16.msra.mxu0 %v2156_v39 }
 0x4da   :  { %2161 = vmatprep.subr.bf16.mxu0 %v2160_v42 }
 0x4dd   :  { %2163 = vmatpush3.bf16.msra.mxu0 %v2160_v42 }
 0x5a3   :  { %v1993_v47 = vpop.f32.mrb[4].mxu0 }
 0x5a4   :  { %v636_v48 = vadd.f32 %v1993_v47, %v557_v46  ;;  %v630_v49 = vpop.f32.mrb[5].mxu0 }
 0x5a5   :  { %v631_v50 = vadd.f32 %v630_v49, %v557_v46 }
 0x5a6   :  { %v640_v51 = vadd.f32 %v636_v48, %v2394_v7 }
 0x5a7   :  { %v639_v52 = vadd.f32 %v631_v50, %v2387_v5  ;;  %v38_v5 = vld [vmem:[%s2731_s4] sm:$0xff] }
 0x5a8   :  { %v644_v53 = vsel %vm55_vm0, %v640_v51, 0.0  ;;  %v2140_v1 = vpack.c.bf16 %v39_v0, %v38_v5 }
 0x5a9   :  { %645 = vadd.xlane.f32.xlu1 %v644_v53  ;;  %v641_v54 = vsel %vm55_vm0, %v639_v52, 0.0 }
 0x5aa   :  { %642 = vadd.xlane.f32.xlu0 %v641_v54  ;;  %2141 = vmatprep.subr.bf16.mxu1 %v2140_v1 }
 0x5ab   :  { %2143 = vmatpush3.bf16.msra.mxu1 %v2140_v1 }
 0x5ac   :  { %2145 = vmatprep.subr.bf16.mxu1 %v2144_v4 }
 0x5af   :  { %2147 = vmatpush3.bf16.msra.mxu1 %v2144_v4 }
 0x636   :  { %v646_v55 = vpop.xlane.xlu1 %645 }
 0x637   :  { %v649_v56 = vmul.f32 0.03125, %v646_v55  ;;  %v643_v57 = vpop.xlane.xlu0 %642 }
 0x638   :  { %v648_v58 = vmul.f32 0.03125, %v643_v57 }
 0x639   :  { %v651_v59 = vsub.f32 %v640_v51, %v649_v56 }
 0x63a   :  { %v650_v60 = vsub.f32 %v639_v52, %v648_v58 }
 0x63b   :  { %v653_v63 = vmul.f32 %v651_v59, %v651_v59 }
 0x63c   :  { %v652_v61 = vmul.f32 %v650_v60, %v650_v60 }
 0x63d   :  { %v657_v7 = vsel %vm55_vm0, %v653_v63, 0.0 }
 0x63e   :  { %v654_v62 = vsel %vm55_vm0, %v652_v61, 0.0 }
 0x63f   :  { %655 = vadd.xlane.f32.xlu0 %v654_v62 }
 0x643   :  { %658 = vadd.xlane.f32.xlu0 %v657_v7 }
 0x6cc   :  { %v656_v6 = vpop.xlane.xlu0 %655 }
 0x6cd   :  { %v660_v8 = vmul.f32 0.03125, %v656_v6 }
 0x6cf   :  { %v662_v12 = vadd.f32 1e-12, %v660_v8 }
 0x6d0   :  { %v659_v13 = vpop.xlane.xlu0 %658 }
 0x6d1   :  { %2286 = vrsqrt.f32 %v662_v12  ;;  %v661_v14 = vmul.f32 0.03125, %v659_v13 }
 0x6d3   :  { %v663_v15 = vadd.f32 1e-12, %v661_v14 }
 0x6d5   :  { %2288 = vrsqrt.f32 %v663_v15 }
 0x6db   :  { %v2287_v20 = vpop.eup %2286 }
 0x6dc   :  { %v666_v22 = vmul.f32 %v2287_v20, %v650_v60 }
 0x6de   :  { %v672_v23 = vmul.f32 %v671_v19, %v666_v22 }
 0x6df   :  { %v2289_v24 = vpop.eup %2288 }
 0x6e0   :  { %v667_v25 = vmul.f32 %v2289_v24, %v651_v59  ;;  %v678_v26 = vadd.f32 %v677_v17, %v672_v23 }
 0x6e2   :  { %v673_v27 = vmul.f32 %v671_v19, %v667_v25  ;;  %2002 = vmatprep.mubr.msk.f32.mxu1 %vm55_vm0, %v678_v26 }
 0x6e4   :  { %v679_v28 = vadd.f32 %v677_v17, %v673_v27 }
 0x6e6   :  { %2003 = vmatmul.mubr.msk.f32.vlgmr.msra.gmra.mrb[6].mxu1 %vm55_vm0, %v679_v28 }
 0x7b9   :  { %v2004_v46 = vpop.f32.mrb[6].mxu1 }
 0x7ba   :  { %v762_v47 = vadd.f32 %v2004_v46, %v683_v44  ;;  %v756_v48 = vpop.f32.mrb[7].mxu1  ;;  %v899_v46 = vsub.s32 6, %v2398_v9 }
 0x7bb   :  { %v757_v49 = vadd.f32 %v756_v48, %v683_v44 }
 0x7bc   :  { %v766_v50 = vmul.f32 %v762_v47, %v762_v47  ;;  %v900_v48 = vrot.slane %v2404_v11, %v899_v46 }
 0x7bd   :  { %v765_v51 = vmul.f32 %v757_v49, %v757_v49 }
 0x7be   :  { %v768_v52 = vmul.f32 %v766_v50, %v762_v47 }
 0x7bf   :  { %v767_v53 = vmul.f32 %v765_v51, %v757_v49 }
 0x7c0   :  { %v770_v54 = vmul.f32 0.044715, %v768_v52 }
 0x7c1   :  { %v769_v55 = vmul.f32 0.044715, %v767_v53 }
 0x7c2   :  { %v772_v56 = vadd.f32 %v770_v54, %v762_v47 }
 0x7c3   :  { %v771_v57 = vadd.f32 %v769_v55, %v757_v49 }
 0x7c4   :  { %v774_v58 = vmul.f32 0.7978846, %v772_v56 }
 0x7c5   :  { %v773_v59 = vmul.f32 0.7978846, %v771_v57 }
 0x7c6   :  { %2290 = vtanh.f32 %v774_v58  ;;  %v2584_v58 = vld [vmem:[%s2728_s6 + $0x8] sm:$0xff] }
 0x7c7   :  { %2292 = vtanh.f32 %v773_v59 }
 0x7d0   :  { %v2291_v60 = vpop.eup %2290 }
 0x7d1   :  { %v2293_v61 = vpop.eup %2292  ;;  %v778_v62 = vadd.f32 1.0, %v2291_v60 }
 0x7d2   :  { %v777_v63 = vadd.f32 1.0, %v2293_v61 }
 0x7d3   :  { %v780_v7 = vmul.f32 0.5, %v778_v62 }
 0x7d4   :  { %v779_v5 = vmul.f32 0.5, %v777_v63 }
 0x7d5   :  { %v782_v1 = vmul.f32 %v780_v7, %v762_v47  ;;  %v905_v47 = vsub.s32 7, %v2398_v9 }
 0x7d6   :  { %v781_v0 = vmul.f32 %v779_v5, %v757_v49 }
 0x7d7   :  { %v906_v53 = vrot.slane %v2404_v11, %v905_v47  ;;  %v938_v11 = vrot.slane %v2584_v58, %v53_v10 }
 0x7d8   :  { %2021 = vmatprep.mubr.msk.f32.mxu0 %vm787_vm3, %v781_v0 }
 0x7d9   :  { %2022 = vmatmul.mubr.msk.f32.vlgmr.msra.gmra.mrb[6].mxu0 %vm787_vm3, %v782_v1 }
 0x8ac   :  { %v2023_v4 = vpop.f32.mrb[6].mxu0 }
 0x8ad   :  { %v866_v6 = vadd.f32 %v2023_v4, %v786_v3  ;;  %v860_v8 = vpop.f32.mrb[7].mxu0 }
 0x8ae   :  { %v861_v12 = vadd.f32 %v860_v8, %v786_v3 }
 0x8af   :  { %v870_v13 = vadd.f32 %v866_v6, %v679_v28 }
 0x8b0   :  { %v869_v14 = vadd.f32 %v861_v12, %v678_v26  ;;  %v1815_v26 = vld [vmem:[%s2726_s2 + $0x20] sm:$0xff] }
 0x8b1   :  { %v874_v15 = vsel %vm55_vm0, %v870_v13, 0.0  ;;  %v2164_v34 = vpack.c.bf16 %v1816_v32, %v1815_v26 }
 0x8b2   :  { %875 = vadd.xlane.f32.xlu0 %v874_v15  ;;  %v871_v19 = vsel %vm55_vm0, %v869_v14, 0.0 }
 0x8b3   :  { %872 = vadd.xlane.f32.xlu1 %v871_v19  ;;  %2165 = vmatprep.subr.bf16.mxu1 %v2164_v34 }
 0x8b4   :  { %2167 = vmatpush3.bf16.msra.mxu1 %v2164_v34 }
 0x8b5   :  { %2169 = vmatprep.subr.bf16.mxu1 %v2168_v37 }
 0x8b8   :  { %2171 = vmatpush3.bf16.msra.mxu1 %v2168_v37 }
 0x93f   :  { %v876_v20 = vpop.xlane.xlu0 %875 }
 0x940   :  { %v878_v22 = vmul.f32 0.03125, %v876_v20  ;;  %v873_v17 = vpop.xlane.xlu1 %872 }
 0x941   :  { %v877_v23 = vmul.f32 0.03125, %v873_v17 }
 0x942   :  { %v880_v24 = vsub.f32 %v870_v13, %v878_v22 }
 0x943   :  { %v879_v25 = vsub.f32 %v869_v14, %v877_v23 }
 0x944   :  { %v882_v27 = vmul.f32 %v880_v24, %v880_v24 }
 0x945   :  { %v881_v29 = vmul.f32 %v879_v25, %v879_v25 }
 0x946   :  { %v886_v31 = vsel %vm55_vm0, %v882_v27, 0.0 }
 0x947   :  { %887 = vadd.xlane.f32.xlu0 %v886_v31  ;;  %v883_v28 = vsel %vm55_vm0, %v881_v29, 0.0 }
 0x948   :  { %884 = vadd.xlane.f32.xlu1 %v883_v28 }
 0x9d4   :  { %v888_v38 = vpop.xlane.xlu0 %887 }
 0x9d5   :  { %v890_v39 = vmul.f32 0.03125, %v888_v38  ;;  %v885_v40 = vpop.xlane.xlu1 %884 }
 0x9d6   :  { %v889_v41 = vmul.f32 0.03125, %v885_v40 }
 0x9d7   :  { %v892_v42 = vadd.f32 1e-12, %v890_v39 }
 0x9d8   :  { %v891_v44 = vadd.f32 1e-12, %v889_v41 }
 0x9d9   :  { %2294 = vrsqrt.f32 %v892_v42 }
 0x9da   :  { %2296 = vrsqrt.f32 %v891_v44 }
 0x9e3   :  { %v2295_v49 = vpop.eup %2294 }
 0x9e4   :  { %v2297_v50 = vpop.eup %2296  ;;  %v896_v51 = vmul.f32 %v2295_v49, %v880_v24 }
 0x9e5   :  { %v895_v52 = vmul.f32 %v2297_v50, %v879_v25 }
 0x9e6   :  { %v902_v54 = vmul.f32 %v900_v48, %v896_v51 }
 0x9e7   :  { %v901_v55 = vmul.f32 %v900_v48, %v895_v52 }
 0x9e8   :  { %v2575_v57 = vadd.f32 %v906_v53, %v902_v54 }
 0x9e9   :  { %v2573_v56 = vadd.f32 %v906_v53, %v901_v55 }
 0x9eb   :  { %2032 = vmatprep.mubr.msk.f32.mxu1 %vm55_vm0, %v2573_v56 }
 0x9ec   :  { %2033 = vmatmul.mubr.msk.f32.vlgmr.msra.gmra.mrb[8].mxu1 %vm55_vm0, %v2575_v57 }
 0xabf   :  { %v2034_v59 = vpop.f32.mrb[8].mxu1 }
 0xac0   :  { %v1017_v60 = vadd.f32 %v2034_v59, %v938_v11  ;;  %v1011_v61 = vpop.f32.mrb[9].mxu1 }
 0xac1   :  { %v1012_v62 = vadd.f32 %v1011_v61, %v938_v11 }
 0xac3   :  { %2039 = vmatprep.mubr.msk.f32.mxu1 %vm143_vm1, %v1012_v62  ;;  %v2590_v63 = vpack.i.bf16 %v1017_v60, %v1012_v62 }
 0xac5   :  { %2256 = vrot.lane.b32.xlu0 %v2590_v63, %s2328_s16  ;;  %2251 = vrot.lane.b32.xlu1 %v2590_v63, %s2327_s15 }
 0xac9   :  { %1222 = vrot.lane.b32.xlu1 %v1012_v62, %s2326_s0 }
 0xacd   :  { %1224 = vrot.lane.b32.xlu1 %v1017_v60, %s2326_s0 }
 0xb37   :  { %v2257_v7 = vpop.permute.xlu0 %2256  ;;  %v2252_v10 = vpop.permute.xlu1 %2251 }
 0xb38   :  { %v2259_v5 = vunpack.i.h.bf16 %v2257_v7  ;;  %v2258_v0 = vunpack.i.l.bf16 %v2257_v7  ;;  %v2254_v1 = vunpack.i.h.bf16 %v2252_v10  ;;  %v2253_v3 = vunpack.i.l.bf16 %v2252_v10 }
 0xb3a   :  { %v2172_v4 = vpack.c.bf16 %v2254_v1, %v2253_v3  ;;  %v2182_v6 = vpack.c.bf16 %v2259_v5, %v2258_v0 }
 0xb3b   :  { %v1223_v8 = vpop.permute.xlu1 %1222 }
 0xb3c   :  { %2174 = vmatprep.subr.msk.bf16.mxu1 %vm2420_vm2, %v2172_v4 }
 0xb3d   :  { %2177 = vmatpush3.bf16.xpose.msk.msra.mxu1 %vm2420_vm2, %v2172_v4 }
 0xb3e   :  { %2184 = vmatprep.subr.msk.bf16.mxu1 %vm2420_vm2, %v2182_v6 }
 0xb3f   :  { %v1225_v12 = vpop.permute.xlu1 %1224 }
 0xb44   :  { %2040 = vmatmul.mubr.msk.f32.vlgmr.msra.gmra.mrb[10].mxu1 %vm143_vm1, %v1017_v60 }
 0xb45   :  { %2187 = vmatpush3.bf16.xpose.msk.msra.mxu1 %vm2420_vm2, %v2182_v6  ;;  %2053 = vmatprep.mubr.msk.f32.mxu1 %vm143_vm1, %v1223_v8 }
 0xb4c   :  { %2054 = vmatmul.mubr.msk.f32.vlgmr.msra.gmra.mrb[12].mxu1 %vm143_vm1, %v1225_v12 }
 0xc17   :  { %v2041_v13 = vpop.f32.mrb[10].mxu1 }
 0xc18   :  { %v1110_v14 = vmul.f32 0.25, %v2041_v13  ;;  %v1100_v15 = vpop.f32.mrb[11].mxu1 }
 0xc19   :  { %v1109_v19 = vmul.f32 0.25, %v1100_v15 }
 0xc1a   :  { %v1112_v20 = vadd.f32 %v1110_v14, %v2438_v30 }
 0xc1b   :  { %v1111_v22 = vadd.f32 %v1109_v19, %v2443_v33  ;;  %v1819_v19 = vld [vmem:[%s2730_s3 + $0x20] sm:$0xff] }
 0xc1c   :  { %v1116_v17 = vsel %vm143_vm1, %v1112_v20, -inf }
 0xc1d   :  { %1117 = vmax.xlane.f32.xlu1 %v1116_v17  ;;  %v1113_v23 = vsel %vm143_vm1, %v1111_v22, -inf  ;;  %v1821_v17 = vld [vmem:[%s2730_s3 + $0x30] sm:$0xff] }
 0xc1e   :  { %1114 = vmax.xlane.f32.xlu0 %v1113_v23  ;;  %v1822_v23 = vld [vmem:[%s2730_s3 + $0x38] sm:$0xff] }
 0xc1f   :  { %v2055_v21 = vpop.f32.mrb[12].mxu1 }
 0xc20   :  { %v1304_v24 = vpop.f32.mrb[13].mxu1  ;;  %v1314_v25 = vmul.f32 0.25, %v2055_v21  ;;  %v2196_v21 = vpack.c.bf16 %v1822_v23, %v1821_v17  ;;  %v1831_v17 = vld [vmem:[%s2732_s5 + $0x60] sm:$0xff]  ;;  %v1832_v23 = vld [vmem:[%s2732_s5 + $0x68] sm:$0xff] }
 0xc21   :  { %v1313_v27 = vmul.f32 0.25, %v1304_v24 }
 0xc22   :  { %v1316_v28 = vadd.f32 %v1314_v25, %v2438_v30 }
 0xc23   :  { %v1315_v29 = vadd.f32 %v1313_v27, %v2443_v33 }
 0xc24   :  { %v1320_v26 = vsel %vm143_vm1, %v1316_v28, -inf }
 0xc25   :  { %v1317_v31 = vsel %vm143_vm1, %v1315_v29, -inf }
 0xc26   :  { %1318 = vmax.xlane.f32.xlu0 %v1317_v31 }
 0xc2a   :  { %1321 = vmax.xlane.f32.xlu0 %v1320_v26 }
 0xcaa   :  { %v1118_v32 = vpop.xlane.xlu1 %1117 }
 0xcab   :  { %v1120_v34 = vsub.f32 %v1112_v20, %v1118_v32  ;;  %v1115_v35 = vpop.xlane.xlu0 %1114  ;;  %v1820_v20 = vld [vmem:[%s2730_s3 + $0x28] sm:$0xff] }
 0xcac   :  { %v1119_v36 = vsub.f32 %v1111_v22, %v1115_v35  ;;  %v2192_v22 = vpack.c.bf16 %v1820_v20, %v1819_v19  ;;  %v1830_v20 = vld [vmem:[%s2732_s5 + $0x58] sm:$0xff] }
 0xcad   :  { %v1123_v37 = vmul.f32 1.442695, %v1120_v34  ;;  %v1439_v34 = vrot.slane %v2584_v58, %v556_v45 }
 0xcae   :  { %v1121_v38 = vmul.f32 1.442695, %v1119_v36 }
 0xcaf   :  { %2298 = vpow2.f32 %v1123_v37 }
 0xcb0   :  { %2300 = vpow2.f32 %v1121_v38 }
 0xcb3   :  { %v1319_v39 = vpop.xlane.xlu0 %1318 }
 0xcb4   :  { %v1323_v40 = vsub.f32 %v1315_v29, %v1319_v39 }
 0xcb6   :  { %v1325_v41 = vmul.f32 1.442695, %v1323_v40 }
 0xcb7   :  { %v1322_v33 = vpop.xlane.xlu0 %1321 }
 0xcb8   :  { %2302 = vpow2.f32 %v1325_v41  ;;  %v1324_v42 = vsub.f32 %v1316_v28, %v1322_v33 }
 0xcb9   :  { %v2299_v44 = vpop.eup %2298 }
 0xcba   :  { %v2301_v30 = vpop.eup %2300  ;;  %v1327_v48 = vmul.f32 1.442695, %v1324_v42  ;;  %v1128_v49 = vsel %vm143_vm1, %v2299_v44, 0.0 }
 0xcbb   :  { %1129 = vadd.xlane.f32.xlu0 %v1128_v49  ;;  %v1125_v50 = vsel %vm143_vm1, %v2301_v30, 0.0 }
 0xcbc   :  { %2304 = vpow2.f32 %v1327_v48  ;;  %1126 = vadd.xlane.f32.xlu1 %v1125_v50 }
 0xcc2   :  { %v2303_v51 = vpop.eup %2302 }
 0xcc3   :  { %v1329_v52 = vsel %vm143_vm1, %v2303_v51, 0.0 }
 0xcc4   :  { %1330 = vadd.xlane.f32.xlu1 %v1329_v52 }
 0xcc6   :  { %v2305_v53 = vpop.eup %2304 }
 0xcc7   :  { %v1332_v54 = vsel %vm143_vm1, %v2305_v53, 0.0 }
 0xcc8   :  { %1333 = vadd.xlane.f32.xlu0 %v1332_v54 }
 0xcd5   :  { %2261 = vrot.lane.b32.xlu1 %v2590_v63, %s2329_s1 }
 0xcde   :  { %2266 = vrot.lane.b32.xlu0 %v2590_v63, %s2330_s21 }
 0xd48   :  { %v1130_v11 = vpop.xlane.xlu0 %1129 }
 0xd49   :  { %v1127_v55 = vpop.xlane.xlu1 %1126 }
 0xd4a   :  { %2306 = vrcp.f32 %v1127_v55  ;;  %v1825_v55 = vld [vmem:[%s2731_s4 + $0x30] sm:$0xff] }
 0xd4b   :  { %2308 = vrcp.f32 %v1130_v11  ;;  %v1826_v11 = vld [vmem:[%s2731_s4 + $0x38] sm:$0xff] }
 0xd51   :  { %v1331_v59 = vpop.xlane.xlu1 %1330 }
 0xd52   :  { %2310 = vrcp.f32 %v1331_v59  ;;  %v2204_v59 = vpack.c.bf16 %v1826_v11, %v1825_v55 }
 0xd54   :  { %v2307_v60 = vpop.eup %2306 }
 0xd55   :  { %v2262_v61 = vpop.permute.xlu1 %2261  ;;  %v1334_v62 = vpop.xlane.xlu0 %1333  ;;  %v1133_v7 = vmul.f32 %v2307_v60, %v2301_v30 }
 0xd56   :  { %v2264_v10 = vunpack.i.h.bf16 %v2262_v61  ;;  %v2263_v5 = vunpack.i.l.bf16 %v2262_v61  ;;  %2312 = vrcp.f32 %v1334_v62  ;;  %v2309_v1 = vpop.eup %2308 }
 0xd57   :  { %2046 = vmatprep.mubr.msk.f32.mxu0 %vm143_vm1, %v1133_v7  ;;  %v1134_v8 = vmul.f32 %v2309_v1, %v2299_v44 }
 0xd58   :  { %v2178_v0 = vpack.c.bf16 %v2264_v10, %v2263_v5 }
 0xd59   :  { %v2267_v3 = vpop.permute.xlu0 %2266 }
 0xd5a   :  { %v2269_v4 = vunpack.i.h.bf16 %v2267_v3  ;;  %v2268_v63 = vunpack.i.l.bf16 %v2267_v3  ;;  %2179 = vmatprep.subr.bf16.mxu0 %v2178_v0 }
 0xd5b   :  { %2181 = vmatpush3.bf16.msra.mxu0 %v2178_v0  ;;  %v1552_v0 = vrot.slane %v2584_v58, %v670_v16  ;;  %v1827_v16 = vld [vmem:[%s2732_s5 + $0x40] sm:$0xff] }
 0xd5c   :  { %v2311_v6 = vpop.eup %2310  ;;  %v2188_v12 = vpack.c.bf16 %v2269_v4, %v2268_v63  ;;  %v1558_v4 = vrot.slane %v2584_v58, %v676_v18  ;;  %v1829_v18 = vld [vmem:[%s2732_s5 + $0x50] sm:$0xff] }
 0xd5d   :  { %v1337_v13 = vmul.f32 %v2311_v6, %v2303_v51 }
 0xd5e   :  { %2047 = vmatmul.mubr.msk.f32.vlgmr.msra.gmra.mrb[8].mxu0 %vm143_vm1, %v1134_v8  ;;  %2189 = vmatprep.subr.bf16.mxu0 %v2188_v12 }
 0xd5f   :  { %2191 = vmatpush3.bf16.msra.mxu0 %v2188_v12  ;;  %2060 = vmatprep.mubr.msk.f32.mxu0 %vm143_vm1, %v1337_v13 }
 0xd60   :  { %v2313_v14 = vpop.eup %2312  ;;  %2193 = vmatprep.subr.bf16.mxu0 %v2192_v22 }
 0xd61   :  { %v1338_v15 = vmul.f32 %v2313_v14, %v2305_v53  ;;  %v1824_v53 = vld [vmem:[%s2731_s4 + $0x28] sm:$0xff] }
 0xd63   :  { %2061 = vmatmul.mubr.msk.f32.vlgmr.msra.gmra.mrb[10].mxu0 %vm143_vm1, %v1338_v15  ;;  %v1828_v15 = vld [vmem:[%s2732_s5 + $0x48] sm:$0xff] }
 0xd64   :  { %2195 = vmatpush3.bf16.msra.mxu0 %v2192_v22  ;;  %v2208_v19 = vpack.c.bf16 %v1828_v15, %v1827_v16  ;;  %v2212_v22 = vpack.c.bf16 %v1830_v20, %v1829_v18  ;;  %v1780_v16 = vrot.slane %v2584_v58, %v899_v46  ;;  %v1786_v18 = vrot.slane %v2584_v58, %v905_v47 }
 0xd65   :  { %2197 = vmatprep.subr.bf16.mxu0 %v2196_v21 }
 0xd68   :  { %2199 = vmatpush3.bf16.msra.mxu0 %v2196_v21  ;;  %v2216_v21 = vpack.c.bf16 %v1832_v23, %v1831_v17 }
 0xd69   :  { %2209 = vmatprep.subr.bf16.mxu0 %v2208_v19 }
 0xe31   :  { %v2048_v24 = vpop.f32.mrb[8].mxu0 }
 0xe32   :  { %v1213_v25 = vpop.f32.mrb[9].mxu0 }
 0xe36   :  { %v2062_v27 = vpop.f32.mrb[10].mxu0 }
 0xe37   :  { %v1417_v29 = vpop.f32.mrb[11].mxu0 }
 0xe38   :  { %1428 = vrot.lane.b32.xlu1 %v1417_v29, %s2331_s30  ;;  %v1564_v29 = vrot.slane %v2584_v58, %v682_v43 }
 0xe3c   :  { %1430 = vrot.lane.b32.xlu1 %v2062_v27, %s2331_s30 }
 0xeaa   :  { %v1429_v31 = vpop.permute.xlu1 %1428 }
 0xeab   :  { %v1434_v28 = vsel %vm143_vm1, %v1213_v25, %v1429_v31  ;;  %v1834_v25 = vld [vmem:[%s2732_s5 + $0x78] sm:$0xff] }
 0xeac   :  { %2071 = vmatprep.mubr.msk.f32.mxu0 %vm55_vm0, %v1434_v28 }
 0xeae   :  { %v1431_v26 = vpop.permute.xlu1 %1430 }
 0xeaf   :  { %v1435_v32 = vsel %vm143_vm1, %v2048_v24, %v1431_v26  ;;  %v1833_v24 = vld [vmem:[%s2732_s5 + $0x70] sm:$0xff] }
 0xeb0   :  { %2072 = vmatmul.mubr.msk.f32.vlgmr.msra.gmra.mrb[12].mxu0 %vm55_vm0, %v1435_v32  ;;  %v2220_v27 = vpack.c.bf16 %v1834_v25, %v1833_v24 }
 0xeb1   :  { %2211 = vmatpush3.bf16.msra.mxu0 %v2208_v19 }
 0xeb2   :  { %2213 = vmatprep.subr.bf16.mxu0 %v2212_v22 }
 0xeb5   :  { %2215 = vmatpush3.bf16.msra.mxu0 %v2212_v22 }
 0xeb6   :  { %2217 = vmatprep.subr.bf16.mxu0 %v2216_v21 }
 0xeb9   :  { %2219 = vmatpush3.bf16.msra.mxu0 %v2216_v21 }
 0xeba   :  { %2221 = vmatprep.subr.bf16.mxu0 %v2220_v27 }
 0xebd   :  { %2223 = vmatpush3.bf16.msra.mxu0 %v2220_v27 }
 0xf83   :  { %v2073_v35 = vpop.f32.mrb[12].mxu0 }
 0xf84   :  { %v1518_v36 = vadd.f32 %v2073_v35, %v1439_v34  ;;  %v1512_v37 = vpop.f32.mrb[13].mxu0 }
 0xf85   :  { %v1513_v38 = vadd.f32 %v1512_v37, %v1439_v34 }
 0xf86   :  { %v1522_v39 = vadd.f32 %v1518_v36, %v2575_v57 }
 0xf87   :  { %v1521_v40 = vadd.f32 %v1513_v38, %v2573_v56  ;;  %v1823_v56 = vld [vmem:[%s2731_s4 + $0x20] sm:$0xff] }
 0xf88   :  { %v1526_v41 = vsel %vm55_vm0, %v1522_v39, 0.0  ;;  %v2200_v54 = vpack.c.bf16 %v1824_v53, %v1823_v56 }
 0xf89   :  { %1527 = vadd.xlane.f32.xlu1 %v1526_v41  ;;  %v1523_v33 = vsel %vm55_vm0, %v1521_v40, 0.0 }
 0xf8a   :  { %1524 = vadd.xlane.f32.xlu0 %v1523_v33  ;;  %2201 = vmatprep.subr.bf16.mxu1 %v2200_v54 }
 0xf8b   :  { %2203 = vmatpush3.bf16.msra.mxu1 %v2200_v54 }
 0xf8c   :  { %2205 = vmatprep.subr.bf16.mxu1 %v2204_v59 }
 0xf8f   :  { %2207 = vmatpush3.bf16.msra.mxu1 %v2204_v59 }
0x1016   :  { %v1528_v42 = vpop.xlane.xlu1 %1527 }
0x1017   :  { %v1530_v44 = vmul.f32 0.03125, %v1528_v42  ;;  %v1525_v30 = vpop.xlane.xlu0 %1524 }
0x1018   :  { %v1529_v48 = vmul.f32 0.03125, %v1525_v30 }
0x1019   :  { %v1532_v49 = vsub.f32 %v1522_v39, %v1530_v44 }
0x101a   :  { %v1531_v45 = vsub.f32 %v1521_v40, %v1529_v48 }
0x101b   :  { %v1534_v52 = vmul.f32 %v1532_v49, %v1532_v49 }
0x101c   :  { %v1533_v50 = vmul.f32 %v1531_v45, %v1531_v45 }
0x101d   :  { %v1538_v57 = vsel %vm55_vm0, %v1534_v52, 0.0  ;;  %v1667_v52 = vrot.slane %v2584_v58, %v785_v2 }
0x101e   :  { %v1535_v51 = vsel %vm55_vm0, %v1533_v50, 0.0 }
0x101f   :  { %1536 = vadd.xlane.f32.xlu0 %v1535_v51 }
0x1023   :  { %1539 = vadd.xlane.f32.xlu0 %v1538_v57 }
0x10ac   :  { %v1537_v60 = vpop.xlane.xlu0 %1536 }
0x10ad   :  { %v1541_v61 = vmul.f32 0.03125, %v1537_v60 }
0x10af   :  { %v1543_v62 = vadd.f32 1e-12, %v1541_v61 }
0x10b0   :  { %v1540_v7 = vpop.xlane.xlu0 %1539 }
0x10b1   :  { %2314 = vrsqrt.f32 %v1543_v62  ;;  %v1542_v10 = vmul.f32 0.03125, %v1540_v7 }
0x10b3   :  { %v1544_v5 = vadd.f32 1e-12, %v1542_v10 }
0x10b5   :  { %2316 = vrsqrt.f32 %v1544_v5 }
0x10bb   :  { %v2315_v1 = vpop.eup %2314 }
0x10bc   :  { %v1547_v3 = vmul.f32 %v2315_v1, %v1531_v45 }
0x10be   :  { %v1553_v63 = vmul.f32 %v1552_v0, %v1547_v3 }
0x10bf   :  { %v2317_v6 = vpop.eup %2316 }
0x10c0   :  { %v1548_v8 = vmul.f32 %v2317_v6, %v1532_v49  ;;  %v1559_v12 = vadd.f32 %v1558_v4, %v1553_v63 }
0x10c2   :  { %v1554_v13 = vmul.f32 %v1552_v0, %v1548_v8  ;;  %2082 = vmatprep.mubr.msk.f32.mxu1 %vm55_vm0, %v1559_v12 }
0x10c4   :  { %v1560_v14 = vadd.f32 %v1558_v4, %v1554_v13 }
0x10c6   :  { %2083 = vmatmul.mubr.msk.f32.vlgmr.msra.gmra.mrb[14].mxu1 %vm55_vm0, %v1560_v14 }
0x1199   :  { %v2084_v31 = vpop.f32.mrb[14].mxu1 }
0x119a   :  { %v1643_v28 = vadd.f32 %v2084_v31, %v1564_v29  ;;  %v1637_v26 = vpop.f32.mrb[15].mxu1 }
0x119b   :  { %v1638_v32 = vadd.f32 %v1637_v26, %v1564_v29 }
0x119c   :  { %v1647_v34 = vmul.f32 %v1643_v28, %v1643_v28 }
0x119d   :  { %v1646_v35 = vmul.f32 %v1638_v32, %v1638_v32 }
0x119e   :  { %v1649_v36 = vmul.f32 %v1647_v34, %v1643_v28 }
0x119f   :  { %v1648_v37 = vmul.f32 %v1646_v35, %v1638_v32 }
0x11a0   :  { %v1651_v38 = vmul.f32 0.044715, %v1649_v36 }
0x11a1   :  { %v1650_v39 = vmul.f32 0.044715, %v1648_v37 }
0x11a2   :  { %v1653_v40 = vadd.f32 %v1651_v38, %v1643_v28 }
0x11a3   :  { %v1652_v41 = vadd.f32 %v1650_v39, %v1638_v32 }
0x11a4   :  { %v1655_v33 = vmul.f32 0.7978846, %v1653_v40 }
0x11a5   :  { %v1654_v42 = vmul.f32 0.7978846, %v1652_v41 }
0x11a6   :  { %2318 = vtanh.f32 %v1655_v33 }
0x11a7   :  { %2320 = vtanh.f32 %v1654_v42 }
0x11b0   :  { %v2319_v44 = vpop.eup %2318 }
0x11b1   :  { %v2321_v30 = vpop.eup %2320  ;;  %v1659_v48 = vadd.f32 1.0, %v2319_v44 }
0x11b2   :  { %v1658_v43 = vadd.f32 1.0, %v2321_v30 }
0x11b3   :  { %v1661_v49 = vmul.f32 0.5, %v1659_v48 }
0x11b4   :  { %v1660_v45 = vmul.f32 0.5, %v1658_v43 }
0x11b5   :  { %v1663_v51 = vmul.f32 %v1661_v49, %v1643_v28 }
0x11b6   :  { %v1662_v50 = vmul.f32 %v1660_v45, %v1638_v32 }
0x11b8   :  { %2101 = vmatprep.mubr.msk.f32.mxu0 %vm787_vm3, %v1662_v50 }
0x11b9   :  { %2102 = vmatmul.mubr.msk.f32.vlgmr.msra.gmra.mrb[14].mxu0 %vm787_vm3, %v1663_v51 }
0x128c   :  { %v2103_v57 = vpop.f32.mrb[14].mxu0 }
0x128d   :  { %v1746_v56 = vadd.f32 %v2103_v57, %v1667_v52  ;;  %v1740_v53 = vpop.f32.mrb[15].mxu0 }
0x128e   :  { %v1741_v54 = vadd.f32 %v1740_v53, %v1667_v52 }
0x128f   :  { %v1750_v55 = vadd.f32 %v1746_v56, %v1560_v14 }
0x1290   :  { %v1749_v11 = vadd.f32 %v1741_v54, %v1559_v12 }
0x1291   :  { %v1754_v59 = vsel %vm55_vm0, %v1750_v55, 0.0 }
0x1292   :  { %1755 = vadd.xlane.f32.xlu0 %v1754_v59  ;;  %v1751_v60 = vsel %vm55_vm0, %v1749_v11, 0.0 }
0x1293   :  { %1752 = vadd.xlane.f32.xlu1 %v1751_v60 }
0x131f   :  { %v1756_v61 = vpop.xlane.xlu0 %1755 }
0x1320   :  { %v1758_v62 = vmul.f32 0.03125, %v1756_v61  ;;  %v1753_v7 = vpop.xlane.xlu1 %1752 }
0x1321   :  { %v1757_v10 = vmul.f32 0.03125, %v1753_v7 }
0x1322   :  { %v1760_v5 = vsub.f32 %v1750_v55, %v1758_v62 }
0x1323   :  { %v1759_v0 = vsub.f32 %v1749_v11, %v1757_v10 }
0x1324   :  { %v1762_v1 = vmul.f32 %v1760_v5, %v1760_v5 }
0x1325   :  { %v1761_v2 = vmul.f32 %v1759_v0, %v1759_v0 }
0x1326   :  { %v1766_v3 = vsel %vm55_vm0, %v1762_v1, 0.0 }
0x1327   :  { %1767 = vadd.xlane.f32.xlu0 %v1766_v3  ;;  %v1763_v4 = vsel %vm55_vm0, %v1761_v2, 0.0 }
0x1328   :  { %1764 = vadd.xlane.f32.xlu1 %v1763_v4 }
0x13b4   :  { %v1768_v63 = vpop.xlane.xlu0 %1767 }
0x13b5   :  { %v1770_v6 = vmul.f32 0.03125, %v1768_v63  ;;  %v1765_v8 = vpop.xlane.xlu1 %1764 }
0x13b6   :  { %v1769_v12 = vmul.f32 0.03125, %v1765_v8 }
0x13b7   :  { %v1772_v13 = vadd.f32 1e-12, %v1770_v6 }
0x13b8   :  { %v1771_v14 = vadd.f32 1e-12, %v1769_v12 }
0x13b9   :  { %2322 = vrsqrt.f32 %v1772_v13 }
0x13ba   :  { %2324 = vrsqrt.f32 %v1771_v14 }
0x13c3   :  { %v2323_v15 = vpop.eup %2322 }
0x13c4   :  { %v2325_v19 = vpop.eup %2324  ;;  %v1776_v20 = vmul.f32 %v2323_v15, %v1760_v5 }
0x13c5   :  { %v1775_v22 = vmul.f32 %v2325_v19, %v1759_v0 }
0x13c6   :  { %v1782_v17 = vmul.f32 %v1780_v16, %v1776_v20 }
0x13c7   :  { %v1781_v23 = vmul.f32 %v1780_v16, %v1775_v22 }
0x13c8   :  { %v1788_v21 = vadd.f32 %v1786_v18, %v1782_v17 }
0x13c9   :  { %v1787_v24 = vadd.f32 %v1786_v18, %v1781_v23 }
0x13ca   :  { %1790 = vst.msk [vmem:[%s2733_s7 + $0x8] sm:$0xff] %vm55_vm0, %v1788_v21 }
0x13cb   :  { %1789 = vst.msk [vmem:[%s2733_s7] sm:$0xff] %vm55_vm0, %v1787_v24 }

</bundles_post_ra>
